<compile_context>
chip_gen: v7x
topology: tpu7x:2x2x1
jax: 0.10.0
libtpu: 0.0.40
codegen_flags: <defaults>
</compile_context>

<pallas_src>
import functools

import jax
import jax.numpy as jnp
from jax.experimental import pallas as pl
from jax.experimental.pallas import tpu as pltpu

HIDDEN = (512, 256, 128, 64, 32, 1)


def _round_up(x, m):
    return ((x + m - 1) // m) * m


def fc_critic_kernel(x_ref,
                     w1, b1, w2, b2, w3, b3, w4, b4, w5, b5, w6, b6,
                     o_ref):
    """Fully fused 6-layer MLP: (x @ W + b) with ReLU between layers.

    x arrives as f32 and is cast to the weight dtype (bf16) after DMA; every
    matmul accumulates in f32 on the MXU; bias add + ReLU stay on the f32
    accumulator (v5e has no bf16 VPU path); activations are cast back to the
    weight dtype so each layer runs as a fast bf16 GEMM.
    """
    cdt = w1.dtype

    def layer(h, w_ref, b_ref, relu):
        y = jnp.dot(h, w_ref[...], preferred_element_type=jnp.float32)
        y = y + b_ref[...]
        if relu:
            y = jnp.maximum(y, 0.0)
        return y

    h = x_ref[...].astype(cdt)            # in-kernel downcast (no extra HBM pass)
    h = layer(h, w1, b1, True).astype(cdt)
    h = layer(h, w2, b2, True).astype(cdt)
    h = layer(h, w3, b3, True).astype(cdt)
    h = layer(h, w4, b4, True).astype(cdt)
    h = layer(h, w5, b5, True).astype(cdt)
    # TODO(synk): layers with N=64/32/1 underfill the MXU lane width; a VPU
    # broadcast-mul + lane reduction for the last layer would shave <5%.
    o_ref[...] = layer(h, w6, b6, False).astype(o_ref.dtype)


def init_params(key, input_dim):
    """PyTorch-style uniform(-1/sqrt(fan_in), 1/sqrt(fan_in)) init (f32 masters)."""
    dims = (input_dim,) + HIDDEN
    params = []
    for i in range(len(HIDDEN)):
        key, kw, kb = jax.random.split(key, 3)
        bound = 1.0 / float(dims[i]) ** 0.5
        w = jax.random.uniform(kw, (dims[i], dims[i + 1]), jnp.float32, -bound, bound)
        b = jax.random.uniform(kb, (1, dims[i + 1]), jnp.float32, -bound, bound)
        params.append((w, b))
    return params


def prepare_params(params, compute_dtype=jnp.bfloat16):
    """One-time cast: bf16 weights (MXU operands), f32 biases (accumulator add).

    Call once and reuse the result across forward calls; avoids 12 eager
    dispatches + an HBM pass over the weights on every call.
    """
    flat = []
    for (w, b) in params:
        flat += [w.astype(compute_dtype), b.astype(jnp.float32)]
    return tuple(flat)


@functools.partial(jax.jit, static_argnames=("tile_b",))
def fc_critic_forward(x, flat_params, *, tile_b=2048):
    B = x.shape[0]
    x2 = x.reshape(B, -1)                 # view(B, -1); free under jit (row-major)
    D = x2.shape[1]

    # Batch tile: as large as requested, but (a) clamped to the 8-aligned batch
    # so tiny batches don't compute on padding, and (b) split so the grid has
    # at least 2 steps for mid/large batches (v7x: 2 TensorCores on the
    # "parallel" batch axis; ~free on single-TC v5e/v6e).
    B8 = _round_up(B, 8)
    if B8 > 8:
        tb = min(_round_up(tile_b, 8), _round_up(pl.cdiv(B8, 2), 8))
    else:
        tb = 8
    Bp = _round_up(B, tb)
    if Bp != B:
        x2 = jnp.pad(x2, ((0, Bp - B), (0, 0)))

    in_specs = [pl.BlockSpec((tb, D), lambda i: (i, 0))]
    # Grid-invariant weight/bias blocks: full-array tiles, never re-DMA'd.
    in_specs += [pl.BlockSpec(p.shape, lambda i: (0, 0)) for p in flat_params]

    out = pl.pallas_call(
        fc_critic_kernel,
        out_shape=jax.ShapeDtypeStruct((Bp, 1), jnp.float32),
        grid=(Bp // tb,),
        in_specs=in_specs,
        out_specs=pl.BlockSpec((tb, 1), lambda i: (i, 0)),
        compiler_params=pltpu.CompilerParams(
            dimension_semantics=("parallel",),
            vmem_limit_bytes=48 * 1024 * 1024),
    )(x2, *flat_params)

    return out[:B, 0]                     # out.view(-1) -> shape (B,)


def fc_critic_ref(x, params, compute_dtype=jnp.bfloat16):
    """Pure-JAX reference matching the kernel's mixed precision
    (bf16 operands, f32 accumulation, f32 bias add / ReLU)."""
    h = x.reshape(x.shape[0], -1).astype(compute_dtype)
    for i, (w, b) in enumerate(params):
        y = jnp.dot(h, w.astype(compute_dtype),
                    preferred_element_type=jnp.float32) + b.astype(jnp.float32)
        if i < len(params) - 1:
            h = jnp.maximum(y, 0.0).astype(compute_dtype)
        else:
            h = y
    return h.reshape(-1)


if __name__ == "__main__":
    key = jax.random.PRNGKey(0)
    k_x, k_p = jax.random.split(key)

    # batch=2, channels=4, spatial=16x16 -> input_dim = 4*16*16 = 1024
    x = jax.random.normal(k_x, (2, 4, 16, 16), jnp.float32)
    input_dim = 4 * 16 * 16
    params = init_params(k_p, input_dim)
    flat_params = prepare_params(params)   # one-time cast, reused every call

    out = fc_critic_forward(x, flat_params)
    out = jax.block_until_ready(out)

    ref = fc_critic_ref(x, params)
    assert out.shape == (2,), out.shape
    assert jnp.allclose(out, ref, atol=1e-2, rtol=1e-2), (out, ref)

    print("KERNEL_OK")
</pallas_src>

<mosaic_0001>
module attributes {stable_mosaic.version = 11 : i64} {
  func.func @fc_critic_kernel(%arg0: i32, %arg1: memref<8x1024xf32, #tpu.memory_space<vmem>>, %arg2: memref<1024x512xbf16, #tpu.memory_space<vmem>>, %arg3: memref<1x512xf32, #tpu.memory_space<vmem>>, %arg4: memref<512x256xbf16, #tpu.memory_space<vmem>>, %arg5: memref<1x256xf32, #tpu.memory_space<vmem>>, %arg6: memref<256x128xbf16, #tpu.memory_space<vmem>>, %arg7: memref<1x128xf32, #tpu.memory_space<vmem>>, %arg8: memref<128x64xbf16, #tpu.memory_space<vmem>>, %arg9: memref<1x64xf32, #tpu.memory_space<vmem>>, %arg10: memref<64x32xbf16, #tpu.memory_space<vmem>>, %arg11: memref<1x32xf32, #tpu.memory_space<vmem>>, %arg12: memref<32x1xbf16, #tpu.memory_space<vmem>>, %arg13: memref<1x1xf32, #tpu.memory_space<vmem>>, %arg14: memref<8x1xf32, #tpu.memory_space<vmem>>) attributes {dimension_semantics = [#tpu.dimension_semantics<parallel>], iteration_bounds = array<i64: 1>, scalar_prefetch = 0 : i64, scratch_operands = 0 : i64, tpu.core_type = #tpu.core_type<tc>, window_params = [{transform_indices = @transform_0, window_bounds = array<i64: 8, 1024>}, {pipeline_mode = #tpu.pipeline_mode<synchronous>, transform_indices = @transform_1, window_bounds = array<i64: 1024, 512>}, {pipeline_mode = #tpu.pipeline_mode<synchronous>, transform_indices = @transform_2, window_bounds = array<i64: 1, 512>}, {pipeline_mode = #tpu.pipeline_mode<synchronous>, transform_indices = @transform_3, window_bounds = array<i64: 512, 256>}, {pipeline_mode = #tpu.pipeline_mode<synchronous>, transform_indices = @transform_4, window_bounds = array<i64: 1, 256>}, {pipeline_mode = #tpu.pipeline_mode<synchronous>, transform_indices = @transform_5, window_bounds = array<i64: 256, 128>}, {pipeline_mode = #tpu.pipeline_mode<synchronous>, transform_indices = @transform_6, window_bounds = array<i64: 1, 128>}, {pipeline_mode = #tpu.pipeline_mode<synchronous>, transform_indices = @transform_7, window_bounds = array<i64: 128, 64>}, {pipeline_mode = #tpu.pipeline_mode<synchronous>, transform_indices = @transform_8, window_bounds = array<i64: 1, 64>}, {pipeline_mode = #tpu.pipeline_mode<synchronous>, transform_indices = @transform_9, window_bounds = array<i64: 64, 32>}, {pipeline_mode = #tpu.pipeline_mode<synchronous>, transform_indices = @transform_10, window_bounds = array<i64: 1, 32>}, {pipeline_mode = #tpu.pipeline_mode<synchronous>, transform_indices = @transform_11, window_bounds = array<i64: 32, 1>}, {pipeline_mode = #tpu.pipeline_mode<synchronous>, transform_indices = @transform_12, window_bounds = array<i64: 1, 1>}, {transform_indices = @transform_13, window_bounds = array<i64: 8, 1>}]} {
    %c0 = arith.constant 0 : index
    %c0_0 = arith.constant 0 : index
    %0 = vector.load %arg1[%c0, %c0_0] : memref<8x1024xf32, #tpu.memory_space<vmem>>, vector<8x1024xf32>
    %1 = arith.truncf %0 : vector<8x1024xf32> to vector<8x1024xbf16>
    %c0_1 = arith.constant 0 : index
    %c0_2 = arith.constant 0 : index
    %2 = vector.load %arg2[%c0_1, %c0_2] : memref<1024x512xbf16, #tpu.memory_space<vmem>>, vector<1024x512xbf16>
    %cst = arith.constant dense<0.000000e+00> : vector<8x512xf32>
    %3 = tpu.matmul %1, %2, %cst {dimension_numbers = #tpu.dot_dimension_numbers<[1], [0], [0], [1], [0, 0, 1, 1], [], []>} : vector<8x1024xbf16>, vector<1024x512xbf16>, vector<8x512xf32> -> vector<8x512xf32>
    %c0_3 = arith.constant 0 : index
    %c0_4 = arith.constant 0 : index
    %4 = vector.load %arg3[%c0_3, %c0_4] : memref<1x512xf32, #tpu.memory_space<vmem>>, vector<1x512xf32>
    %5 = vector.broadcast %4 : vector<1x512xf32> to vector<8x512xf32>
    %6 = arith.addf %3, %5 : vector<8x512xf32>
    %cst_5 = arith.constant 0.000000e+00 : f32
    %7 = vector.broadcast %cst_5 : f32 to vector<8x512xf32>
    %8 = arith.maximumf %6, %7 : vector<8x512xf32>
    %9 = arith.truncf %8 : vector<8x512xf32> to vector<8x512xbf16>
    %c0_6 = arith.constant 0 : index
    %c0_7 = arith.constant 0 : index
    %10 = vector.load %arg4[%c0_6, %c0_7] : memref<512x256xbf16, #tpu.memory_space<vmem>>, vector<512x256xbf16>
    %cst_8 = arith.constant dense<0.000000e+00> : vector<8x256xf32>
    %11 = tpu.matmul %9, %10, %cst_8 {dimension_numbers = #tpu.dot_dimension_numbers<[1], [0], [0], [1], [0, 0, 1, 1], [], []>} : vector<8x512xbf16>, vector<512x256xbf16>, vector<8x256xf32> -> vector<8x256xf32>
    %c0_9 = arith.constant 0 : index
    %c0_10 = arith.constant 0 : index
    %12 = vector.load %arg5[%c0_9, %c0_10] : memref<1x256xf32, #tpu.memory_space<vmem>>, vector<1x256xf32>
    %13 = vector.broadcast %12 : vector<1x256xf32> to vector<8x256xf32>
    %14 = arith.addf %11, %13 : vector<8x256xf32>
    %cst_11 = arith.constant 0.000000e+00 : f32
    %15 = vector.broadcast %cst_11 : f32 to vector<8x256xf32>
    %16 = arith.maximumf %14, %15 : vector<8x256xf32>
    %17 = arith.truncf %16 : vector<8x256xf32> to vector<8x256xbf16>
    %c0_12 = arith.constant 0 : index
    %c0_13 = arith.constant 0 : index
    %18 = vector.load %arg6[%c0_12, %c0_13] : memref<256x128xbf16, #tpu.memory_space<vmem>>, vector<256x128xbf16>
    %cst_14 = arith.constant dense<0.000000e+00> : vector<8x128xf32>
    %19 = tpu.matmul %17, %18, %cst_14 {dimension_numbers = #tpu.dot_dimension_numbers<[1], [0], [0], [1], [0, 0, 1, 1], [], []>} : vector<8x256xbf16>, vector<256x128xbf16>, vector<8x128xf32> -> vector<8x128xf32>
    %c0_15 = arith.constant 0 : index
    %c0_16 = arith.constant 0 : index
    %20 = vector.load %arg7[%c0_15, %c0_16] : memref<1x128xf32, #tpu.memory_space<vmem>>, vector<1x128xf32>
    %21 = vector.broadcast %20 : vector<1x128xf32> to vector<8x128xf32>
    %22 = arith.addf %19, %21 : vector<8x128xf32>
    %cst_17 = arith.constant 0.000000e+00 : f32
    %23 = vector.broadcast %cst_17 : f32 to vector<8x128xf32>
    %24 = arith.maximumf %22, %23 : vector<8x128xf32>
    %25 = arith.truncf %24 : vector<8x128xf32> to vector<8x128xbf16>
    %c0_18 = arith.constant 0 : index
    %c0_19 = arith.constant 0 : index
    %26 = vector.load %arg8[%c0_18, %c0_19] : memref<128x64xbf16, #tpu.memory_space<vmem>>, vector<128x64xbf16>
    %cst_20 = arith.constant dense<0.000000e+00> : vector<8x64xf32>
    %27 = tpu.matmul %25, %26, %cst_20 {dimension_numbers = #tpu.dot_dimension_numbers<[1], [0], [0], [1], [0, 0, 1, 1], [], []>} : vector<8x128xbf16>, vector<128x64xbf16>, vector<8x64xf32> -> vector<8x64xf32>
    %c0_21 = arith.constant 0 : index
    %c0_22 = arith.constant 0 : index
    %28 = vector.load %arg9[%c0_21, %c0_22] : memref<1x64xf32, #tpu.memory_space<vmem>>, vector<1x64xf32>
    %29 = vector.broadcast %28 : vector<1x64xf32> to vector<8x64xf32>
    %30 = arith.addf %27, %29 : vector<8x64xf32>
    %cst_23 = arith.constant 0.000000e+00 : f32
    %31 = vector.broadcast %cst_23 : f32 to vector<8x64xf32>
    %32 = arith.maximumf %30, %31 : vector<8x64xf32>
    %33 = arith.truncf %32 : vector<8x64xf32> to vector<8x64xbf16>
    %c0_24 = arith.constant 0 : index
    %c0_25 = arith.constant 0 : index
    %34 = vector.load %arg10[%c0_24, %c0_25] : memref<64x32xbf16, #tpu.memory_space<vmem>>, vector<64x32xbf16>
    %cst_26 = arith.constant dense<0.000000e+00> : vector<8x32xf32>
    %35 = tpu.matmul %33, %34, %cst_26 {dimension_numbers = #tpu.dot_dimension_numbers<[1], [0], [0], [1], [0, 0, 1, 1], [], []>} : vector<8x64xbf16>, vector<64x32xbf16>, vector<8x32xf32> -> vector<8x32xf32>
    %c0_27 = arith.constant 0 : index
    %c0_28 = arith.constant 0 : index
    %36 = vector.load %arg11[%c0_27, %c0_28] : memref<1x32xf32, #tpu.memory_space<vmem>>, vector<1x32xf32>
    %37 = vector.broadcast %36 : vector<1x32xf32> to vector<8x32xf32>
    %38 = arith.addf %35, %37 : vector<8x32xf32>
    %cst_29 = arith.constant 0.000000e+00 : f32
    %39 = vector.broadcast %cst_29 : f32 to vector<8x32xf32>
    %40 = arith.maximumf %38, %39 : vector<8x32xf32>
    %41 = arith.truncf %40 : vector<8x32xf32> to vector<8x32xbf16>
    %c0_30 = arith.constant 0 : index
    %c0_31 = arith.constant 0 : index
    %42 = vector.load %arg12[%c0_30, %c0_31] : memref<32x1xbf16, #tpu.memory_space<vmem>>, vector<32x1xbf16>
    %cst_32 = arith.constant dense<0.000000e+00> : vector<8x1xf32>
    %43 = tpu.matmul %41, %42, %cst_32 {dimension_numbers = #tpu.dot_dimension_numbers<[1], [0], [0], [1], [0, 0, 1, 1], [], []>} : vector<8x32xbf16>, vector<32x1xbf16>, vector<8x1xf32> -> vector<8x1xf32>
    %c0_33 = arith.constant 0 : index
    %c0_34 = arith.constant 0 : index
    %44 = vector.load %arg13[%c0_33, %c0_34] : memref<1x1xf32, #tpu.memory_space<vmem>>, vector<1x1xf32>
    %45 = vector.broadcast %44 : vector<1x1xf32> to vector<8x1xf32>
    %46 = arith.addf %43, %45 : vector<8x1xf32>
    %c0_35 = arith.constant 0 : index
    %c0_36 = arith.constant 0 : index
    %47 = vector.load %arg14[%c0_35, %c0_36] : memref<8x1xf32, #tpu.memory_space<vmem>>, vector<8x1xf32>
    tpu.vector_store %arg14[%c0_35, %c0_36], %46 {strides = array<i32>} : memref<8x1xf32, #tpu.memory_space<vmem>>, vector<8x1xf32>,
    return
  }
  func.func @transform_0(%arg0: i32) -> (i32, i32) {
    %c0_i32 = arith.constant 0 : i32
    %c0_i32_0 = arith.constant 0 : i32
    return %arg0, %c0_i32 : i32, i32
  }
  func.func @transform_1(%arg0: i32) -> (i32, i32) {
    %c0_i32 = arith.constant 0 : i32
    %c0_i32_0 = arith.constant 0 : i32
    %c0_i32_1 = arith.constant 0 : i32
    return %c0_i32, %c0_i32_0 : i32, i32
  }
  func.func @transform_2(%arg0: i32) -> (i32, i32) {
    %c0_i32 = arith.constant 0 : i32
    %c0_i32_0 = arith.constant 0 : i32
    %c0_i32_1 = arith.constant 0 : i32
    return %c0_i32, %c0_i32_0 : i32, i32
  }
  func.func @transform_3(%arg0: i32) -> (i32, i32) {
    %c0_i32 = arith.constant 0 : i32
    %c0_i32_0 = arith.constant 0 : i32
    %c0_i32_1 = arith.constant 0 : i32
    return %c0_i32, %c0_i32_0 : i32, i32
  }
  func.func @transform_4(%arg0: i32) -> (i32, i32) {
    %c0_i32 = arith.constant 0 : i32
    %c0_i32_0 = arith.constant 0 : i32
    %c0_i32_1 = arith.constant 0 : i32
    return %c0_i32, %c0_i32_0 : i32, i32
  }
  func.func @transform_5(%arg0: i32) -> (i32, i32) {
    %c0_i32 = arith.constant 0 : i32
    %c0_i32_0 = arith.constant 0 : i32
    %c0_i32_1 = arith.constant 0 : i32
    return %c0_i32, %c0_i32_0 : i32, i32
  }
  func.func @transform_6(%arg0: i32) -> (i32, i32) {
    %c0_i32 = arith.constant 0 : i32
    %c0_i32_0 = arith.constant 0 : i32
    %c0_i32_1 = arith.constant 0 : i32
    return %c0_i32, %c0_i32_0 : i32, i32
  }
  func.func @transform_7(%arg0: i32) -> (i32, i32) {
    %c0_i32 = arith.constant 0 : i32
    %c0_i32_0 = arith.constant 0 : i32
    %c0_i32_1 = arith.constant 0 : i32
    return %c0_i32, %c0_i32_0 : i32, i32
  }
  func.func @transform_8(%arg0: i32) -> (i32, i32) {
    %c0_i32 = arith.constant 0 : i32
    %c0_i32_0 = arith.constant 0 : i32
    %c0_i32_1 = arith.constant 0 : i32
    return %c0_i32, %c0_i32_0 : i32, i32
  }
  func.func @transform_9(%arg0: i32) -> (i32, i32) {
    %c0_i32 = arith.constant 0 : i32
    %c0_i32_0 = arith.constant 0 : i32
    %c0_i32_1 = arith.constant 0 : i32
    return %c0_i32, %c0_i32_0 : i32, i32
  }
  func.func @transform_10(%arg0: i32) -> (i32, i32) {
    %c0_i32 = arith.constant 0 : i32
    %c0_i32_0 = arith.constant 0 : i32
    %c0_i32_1 = arith.constant 0 : i32
    return %c0_i32, %c0_i32_0 : i32, i32
  }
  func.func @transform_11(%arg0: i32) -> (i32, i32) {
    %c0_i32 = arith.constant 0 : i32
    %c0_i32_0 = arith.constant 0 : i32
    %c0_i32_1 = arith.constant 0 : i32
    return %c0_i32, %c0_i32_0 : i32, i32
  }
  func.func @transform_12(%arg0: i32) -> (i32, i32) {
    %c0_i32 = arith.constant 0 : i32
    %c0_i32_0 = arith.constant 0 : i32
    %c0_i32_1 = arith.constant 0 : i32
    return %c0_i32, %c0_i32_0 : i32, i32
  }
  func.func @transform_13(%arg0: i32) -> (i32, i32) {
    %c0_i32 = arith.constant 0 : i32
    %c0_i32_0 = arith.constant 0 : i32
    return %arg0, %c0_i32 : i32, i32
  }
}

</mosaic_0001>

<bundles_post_ra>
// kernel: fc_critic_forward.1
= control target key start
LH: loop header
LB: loop body
LE: loop exit
PB: predicated region body
PF: predicated region fallthrough
CT: control target
= control target key end

     0   :  { %s4232_s0 = inlined_call_operand.vmem [shape: f32[8,1024], index: 0, kind: input, shape index: {}]   ;;  %s4233_s1 = inlined_call_operand.hbm [shape: bf16[1024,512], index: 1, kind: input, shape index: {}]   ;;  %s4234_s2 = inlined_call_operand.vmem [shape: f32[1,512], index: 2, kind: input, shape index: {}]   ;;  %s4235_s3 = inlined_call_operand.hbm [shape: bf16[512,256], index: 3, kind: input, shape index: {}]   ;;  %s4236_s4 = inlined_call_operand.vmem [shape: f32[1,256], index: 4, kind: input, shape index: {}]   ;;  %s4237_s5 = inlined_call_operand.vmem [shape: bf16[256,128], index: 5, kind: input, shape index: {}]   ;;  %s4238_s6 = inlined_call_operand.vmem [shape: f32[1,128], index: 6, kind: input, shape index: {}]   ;;  %s4239_s7 = inlined_call_operand.vmem [shape: bf16[128,64], index: 7, kind: input, shape index: {}]   ;;  %s4240_s8 = inlined_call_operand.vmem [shape: f32[1,64], index: 8, kind: input, shape index: {}]   ;;  %s4241_s9 = inlined_call_operand.vmem [shape: bf16[64,32], index: 9, kind: input, shape index: {}]   ;;  %s4242_s10 = inlined_call_operand.vmem [shape: f32[1,32], index: 10, kind: input, shape index: {}]   ;;  %s4243_s11 = inlined_call_operand.vmem [shape: bf16[32,1], index: 11, kind: input, shape index: {}]   ;;  %s4244_s12 = inlined_call_operand.<no memory space> [shape: f32[1,1], index: 12, kind: input, shape index: {}]   ;;  %s4245_s13 = inlined_call_operand.vmem [shape: f32[8,1], index: 13, kind: output, shape index: {}]  }
   0x1   :  { %v18_v0 = vstv %s4244_s12 }
   0x2   :  { %19 = vst [vmem:[#allocation2] sm:$0x1] %v18_v0 }
   0x3   :  { %20 = vsyncpa [#allocation4], 0 }
   0x4   :  { %21 = vsyncpa [#allocation6], 0  ;;  %s3952_s27 = smov [#allocation3]   ;;  %s3904_s14 = scalar_lea.hbm %s4233_s1, 32768 }
   0x5   :  { %s29_s28 = sshll.u32 %s3952_s27, 4  ;;  %p3905_p0 = scmp.ne.s32.totalorder %s4233_s1, %s3904_s14  ;;  %s30_s28 = int_to_ptr.vmem [resolvable:$true] %s29_s28 }
   0x6   :  { %p3908_p1 = scmp.lt.u32.totalorder %s3904_s14, %s4233_s1 }
   0x8   :  { %p3910_p2 = pnand %p3908_p1, %p3905_p0 }
   0xa   :  { %3913 = shalt.err (!%p3910_p2)
}
   0xb   :  { %s3914_s12 = scalar_lea.vmem %s30_s28, 32768  ;;  %p3919_p4 = scmp.lt.s32.totalorder %s30_s28, %s30_s28 }
   0xc   :  { %p3915_p3 = scmp.ne.s32.totalorder %s30_s28, %s3914_s12  ;;  %p3920_p5 = scmp.lt.s32.totalorder %s3914_s12, %s3914_s12 }
   0xe   :  { %p3921_p6 = por %p3920_p5, %p3919_p4 }
  0x10   :  { %p3922_p7 = pnand %p3921_p6, %p3915_p3 }
  0x12   :  { %3925 = shalt.err (!%p3922_p7)
}
  0x13   :  { %s3953_s19 = smov 256   ;;  %s3954_s20 = smov 16  }
  0x14   :  { %35 = dma.hbm_to_vmem [thread:$0]  %s4233_s1, 32768, %s30_s28, [#allocation4], %s3953_s19, %s3953_s19, %s3954_s20  }
  0x15   :  { %s3955_s23 = smov [#allocation5]   ;;  %s3926_s27 = scalar_lea.hbm %s4235_s3, 8192 }
  0x16   :  { %s43_s24 = sshll.u32 %s3955_s23, 4  ;;  %p3927_p8 = scmp.ne.s32.totalorder %s4235_s3, %s3926_s27  ;;  %s44_s24 = int_to_ptr.vmem [resolvable:$true] %s43_s24 }
  0x17   :  { %p3930_p9 = scmp.lt.u32.totalorder %s3926_s27, %s4235_s3 }
  0x19   :  { %p3932_p10 = pnand %p3930_p9, %p3927_p8 }
  0x1b   :  { %3935 = shalt.err (!%p3932_p10)
}
  0x1c   :  { %s3936_s16 = scalar_lea.vmem %s44_s24, 8192  ;;  %p3941_p12 = scmp.lt.s32.totalorder %s44_s24, %s44_s24 }
  0x1d   :  { %p3937_p11 = scmp.ne.s32.totalorder %s44_s24, %s3936_s16  ;;  %p3942_p13 = scmp.lt.s32.totalorder %s3936_s16, %s3936_s16 }
  0x1f   :  { %p3943_p0 = por %p3942_p13, %p3941_p12 }
  0x21   :  { %p3944_p1 = pnand %p3943_p0, %p3937_p11 }
  0x23   :  { %3947 = shalt.err (!%p3944_p1)
}
  0x24   :  { %s3956_s1 = smov 128   ;;  %s3957_s28 = smov 8  }
  0x25   :  { %49 = dma.hbm_to_vmem [thread:$0]  %s4235_s3, 8192, %s44_s24, [#allocation6], %s3956_s1, %s3956_s1, %s3957_s28  }
  0x26   :  { %3948 = dma.done.wait [#allocation4], 32768  }
  0x27   :  { %3949 = vsyncadd [#allocation4], 4294934528 }
  0x28   :  { %3950 = dma.done.wait [#allocation6], 8192  }
  0x29   :  { %3951 = vsyncadd [#allocation6], 4294959104  ;;  %v3394_v1 = vld [vmem:[#allocation3 + $0x4] ss:$16 sps:$4 sm:$0xff]   ;;  %v3396_v2 = vld [vmem:[#allocation3 + $0xc] ss:$16 sps:$4 sm:$0xff]  }
  0x2a   :  { %1649 = vmatprep.subr.bf16.mxu0 %v3394_v1  ;;  %v3398_v3 = vld [vmem:[#allocation3] ss:$16 sps:$4 sm:$0xff]   ;;  %v3399_v4 = vld [vmem:[#allocation3 + $0x8] ss:$16 sps:$4 sm:$0xff]   ;;  %1813 = vmatprep.subr.bf16.mxu1 %v3396_v2  ;;  %v3400_v5 = vld [vmem:[#allocation3 + $0x24] ss:$16 sps:$4 sm:$0xff]  }
  0x2b   :  { %1650 = vmatpush1.bf16.msra.mxu0 %v3398_v3  ;;  %1814 = vmatpush1.bf16.msra.mxu1 %v3399_v4  ;;  %v3402_v6 = vld [vmem:[#allocation3 + $0x2c] ss:$16 sps:$4 sm:$0xff]   ;;  %v3404_v7 = vld [vmem:[#allocation3 + $0x20] ss:$16 sps:$4 sm:$0xff]   ;;  %v3405_v8 = vld [vmem:[#allocation3 + $0x28] ss:$16 sps:$4 sm:$0xff]  }
  0x2c   :  { %1651 = vmatprep.subr.bf16.mxu0 %v3400_v5  ;;  %1815 = vmatprep.subr.bf16.mxu1 %v3402_v6  ;;  %v3406_v9 = vld [vmem:[#allocation3 + $0x44] ss:$16 sps:$4 sm:$0xff]   ;;  %v3408_v10 = vld [vmem:[#allocation3 + $0x4c] ss:$16 sps:$4 sm:$0xff]   ;;  %v3410_v11 = vld [vmem:[#allocation3 + $0x40] ss:$16 sps:$4 sm:$0xff]  }
  0x2d   :  { %v3411_v12 = vld [vmem:[#allocation3 + $0x48] ss:$16 sps:$4 sm:$0xff]   ;;  %v3412_v13 = vld [vmem:[#allocation3 + $0x64] ss:$16 sps:$4 sm:$0xff]   ;;  %v3414_v14 = vld [vmem:[#allocation3 + $0x6c] ss:$16 sps:$4 sm:$0xff]  }
  0x2e   :  { %v3416_v15 = vld [vmem:[#allocation3 + $0x60] ss:$16 sps:$4 sm:$0xff]   ;;  %v3417_v16 = vld [vmem:[#allocation3 + $0x68] ss:$16 sps:$4 sm:$0xff]   ;;  %v3418_v17 = vld [vmem:[#allocation3 + $0x84] ss:$16 sps:$4 sm:$0xff]  }
  0x2f   :  { %1652 = vmatpush1.bf16.msra.mxu0 %v3404_v7  ;;  %1816 = vmatpush1.bf16.msra.mxu1 %v3405_v8  ;;  %v3420_v18 = vld [vmem:[#allocation3 + $0x8c] ss:$16 sps:$4 sm:$0xff]   ;;  %v3422_v19 = vld [vmem:[#allocation3 + $0x80] ss:$16 sps:$4 sm:$0xff]   ;;  %v3423_v20 = vld [vmem:[#allocation3 + $0x88] ss:$16 sps:$4 sm:$0xff]  }
  0x30   :  { %1653 = vmatprep.subr.bf16.mxu0 %v3406_v9  ;;  %1817 = vmatprep.subr.bf16.mxu1 %v3408_v10  ;;  %v3424_v21 = vld [vmem:[#allocation3 + $0xa4] ss:$16 sps:$4 sm:$0xff]   ;;  %v3426_v22 = vld [vmem:[#allocation3 + $0xac] ss:$16 sps:$4 sm:$0xff]   ;;  %v3428_v23 = vld [vmem:[#allocation3 + $0xa0] ss:$16 sps:$4 sm:$0xff]  }
  0x31   :  { %v3429_v24 = vld [vmem:[#allocation3 + $0xa8] ss:$16 sps:$4 sm:$0xff]   ;;  %v3430_v25 = vld [vmem:[#allocation3 + $0xc4] ss:$16 sps:$4 sm:$0xff]   ;;  %v3432_v26 = vld [vmem:[#allocation3 + $0xcc] ss:$16 sps:$4 sm:$0xff]  }
  0x32   :  { %v3434_v27 = vld [vmem:[#allocation3 + $0xc0] ss:$16 sps:$4 sm:$0xff]   ;;  %v3435_v28 = vld [vmem:[#allocation3 + $0xc8] ss:$16 sps:$4 sm:$0xff]   ;;  %v3436_v29 = vld [vmem:[#allocation3 + $0xe4] ss:$16 sps:$4 sm:$0xff]  }
  0x33   :  { %1654 = vmatpush1.bf16.msra.mxu0 %v3410_v11  ;;  %1818 = vmatpush1.bf16.msra.mxu1 %v3411_v12  ;;  %v3438_v30 = vld [vmem:[#allocation3 + $0xec] ss:$16 sps:$4 sm:$0xff]   ;;  %v3440_v31 = vld [vmem:[#allocation3 + $0xe0] ss:$16 sps:$4 sm:$0xff]   ;;  %v3441_v32 = vld [vmem:[#allocation3 + $0xe8] ss:$16 sps:$4 sm:$0xff]  }
  0x34   :  { %1655 = vmatprep.subr.bf16.mxu0 %v3412_v13  ;;  %1819 = vmatprep.subr.bf16.mxu1 %v3414_v14  ;;  %v3442_v33 = vld [vmem:[#allocation3 + $0x104] ss:$16 sps:$4 sm:$0xff]   ;;  %v3444_v34 = vld [vmem:[#allocation3 + $0x10c] ss:$16 sps:$4 sm:$0xff]   ;;  %v3446_v35 = vld [vmem:[#allocation3 + $0x100] ss:$16 sps:$4 sm:$0xff]  }
  0x35   :  { %v3447_v36 = vld [vmem:[#allocation3 + $0x108] ss:$16 sps:$4 sm:$0xff]   ;;  %v3448_v37 = vld [vmem:[#allocation3 + $0x124] ss:$16 sps:$4 sm:$0xff]   ;;  %v3450_v38 = vld [vmem:[#allocation3 + $0x12c] ss:$16 sps:$4 sm:$0xff]  }
  0x36   :  { %v3452_v39 = vld [vmem:[#allocation3 + $0x120] ss:$16 sps:$4 sm:$0xff]   ;;  %v3453_v40 = vld [vmem:[#allocation3 + $0x128] ss:$16 sps:$4 sm:$0xff]   ;;  %v3454_v41 = vld [vmem:[#allocation3 + $0x144] ss:$16 sps:$4 sm:$0xff]  }
  0x37   :  { %1656 = vmatpush1.bf16.msra.mxu0 %v3416_v15  ;;  %1820 = vmatpush1.bf16.msra.mxu1 %v3417_v16  ;;  %v3456_v42 = vld [vmem:[#allocation3 + $0x14c] ss:$16 sps:$4 sm:$0xff]   ;;  %v3458_v43 = vld [vmem:[#allocation3 + $0x140] ss:$16 sps:$4 sm:$0xff]   ;;  %v3459_v44 = vld [vmem:[#allocation3 + $0x148] ss:$16 sps:$4 sm:$0xff]  }
  0x38   :  { %1657 = vmatprep.subr.bf16.mxu0 %v3418_v17  ;;  %1821 = vmatprep.subr.bf16.mxu1 %v3420_v18  ;;  %v3460_v45 = vld [vmem:[#allocation3 + $0x164] ss:$16 sps:$4 sm:$0xff]   ;;  %v3462_v46 = vld [vmem:[#allocation3 + $0x16c] ss:$16 sps:$4 sm:$0xff]   ;;  %v3464_v48 = vld [vmem:[#allocation3 + $0x160] ss:$16 sps:$4 sm:$0xff]  }
  0x39   :  { %v76_v47 = vld [vmem:[%s4232_s0 + $0x8] sm:$0xff]  ;;  %v3470_v53 = vld [vmem:[#allocation3 + $0x180] ss:$16 sps:$4 sm:$0xff]   ;;  %vm3959_vm0 = vmmov 0   ;;  %vm2796_vm1 = vcmask 523264   ;;  %vm2865_vm2 = vcmask 261120  }
  0x3a   :  { %v84_v49 = vpack.c.bf16 %v76_v47, %v76_v47  ;;  %v3465_v50 = vld [vmem:[#allocation3 + $0x168] ss:$16 sps:$4 sm:$0xff]   ;;  %v3466_v51 = vld [vmem:[#allocation3 + $0x184] ss:$16 sps:$4 sm:$0xff]   ;;  %v3468_v52 = vld [vmem:[#allocation3 + $0x18c] ss:$16 sps:$4 sm:$0xff]  }
  0x3b   :  { %1658 = vmatpush1.bf16.msra.mxu0 %v3422_v19  ;;  %1822 = vmatpush1.bf16.msra.mxu1 %v3423_v20  ;;  %v3471_v54 = vld [vmem:[#allocation3 + $0x188] ss:$16 sps:$4 sm:$0xff]   ;;  %v3472_v55 = vld [vmem:[#allocation3 + $0x1a4] ss:$16 sps:$4 sm:$0xff]   ;;  %v3474_v56 = vld [vmem:[#allocation3 + $0x1ac] ss:$16 sps:$4 sm:$0xff]  }
  0x3c   :  { %1659 = vmatprep.subr.bf16.mxu0 %v3424_v21  ;;  %1823 = vmatprep.subr.bf16.mxu1 %v3426_v22  ;;  %v3476_v57 = vld [vmem:[#allocation3 + $0x1a0] ss:$16 sps:$4 sm:$0xff]   ;;  %v3477_v58 = vld [vmem:[#allocation3 + $0x1a8] ss:$16 sps:$4 sm:$0xff]   ;;  %v3478_v59 = vld [vmem:[#allocation3 + $0x1c4] ss:$16 sps:$4 sm:$0xff]  }
  0x3d   :  { %1681 = vmatprep.mubr.bf16.mxu0 %v84_v49  ;;  %1845 = vmatprep.mubr.bf16.mxu1 %v84_v49  ;;  %v3480_v60 = vld [vmem:[#allocation3 + $0x1cc] ss:$16 sps:$4 sm:$0xff]   ;;  %v3482_v61 = vld [vmem:[#allocation3 + $0x1c0] ss:$16 sps:$4 sm:$0xff]   ;;  %v3483_v62 = vld [vmem:[#allocation3 + $0x1c8] ss:$16 sps:$4 sm:$0xff]  }
  0x3e   :  { %v3484_v63 = vld [vmem:[#allocation3 + $0x1e4] ss:$16 sps:$4 sm:$0xff]   ;;  %v3486_v0 = vld [vmem:[#allocation3 + $0x1ec] ss:$16 sps:$4 sm:$0xff]   ;;  %v3488_v1 = vld [vmem:[#allocation3 + $0x1e0] ss:$16 sps:$4 sm:$0xff]  }
  0x3f   :  { %1660 = vmatpush1.bf16.msra.mxu0 %v3428_v23  ;;  %1824 = vmatpush1.bf16.msra.mxu1 %v3429_v24  ;;  %v3489_v2 = vld [vmem:[#allocation3 + $0x1e8] ss:$16 sps:$4 sm:$0xff]   ;;  %v75_v3 = vld [vmem:[%s4232_s0] sm:$0xff]  ;;  %vm2909_vm3 = vcmask 7168  }
  0x40   :  { %1661 = vmatprep.subr.bf16.mxu0 %v3430_v25  ;;  %1825 = vmatprep.subr.bf16.mxu1 %v3432_v26  ;;  %v3492_v4 = vld [vmem:[#allocation3 + $0x204] ss:$16 sps:$4 sm:$0xff]   ;;  %v3495_v5 = vld [vmem:[#allocation3 + $0x20c] ss:$16 sps:$4 sm:$0xff]   ;;  %v83_v6 = vpack.c.bf16 %v75_v3, %v75_v3  ;;  %v3490_v7 = vld [vmem:[#allocation3 + $0x200] ss:$16 sps:$4 sm:$0xff]  }
  0x41   :  { %v3493_v8 = vld [vmem:[#allocation3 + $0x208] ss:$16 sps:$4 sm:$0xff]   ;;  %v3498_v9 = vld [vmem:[#allocation3 + $0x224] ss:$16 sps:$4 sm:$0xff]   ;;  %v3501_v10 = vld [vmem:[#allocation3 + $0x22c] ss:$16 sps:$4 sm:$0xff]  }
  0x42   :  { %v3496_v11 = vld [vmem:[#allocation3 + $0x220] ss:$16 sps:$4 sm:$0xff]   ;;  %v3499_v12 = vld [vmem:[#allocation3 + $0x228] ss:$16 sps:$4 sm:$0xff]   ;;  %v3504_v13 = vld [vmem:[#allocation3 + $0x244] ss:$16 sps:$4 sm:$0xff]  }
  0x43   :  { %1662 = vmatpush1.bf16.msra.mxu0 %v3434_v27  ;;  %1826 = vmatpush1.bf16.msra.mxu1 %v3435_v28  ;;  %v3507_v14 = vld [vmem:[#allocation3 + $0x24c] ss:$16 sps:$4 sm:$0xff]   ;;  %v3502_v15 = vld [vmem:[#allocation3 + $0x240] ss:$16 sps:$4 sm:$0xff]   ;;  %v3505_v16 = vld [vmem:[#allocation3 + $0x248] ss:$16 sps:$4 sm:$0xff]  }
  0x44   :  { %1663 = vmatprep.subr.bf16.mxu0 %v3436_v29  ;;  %1827 = vmatprep.subr.bf16.mxu1 %v3438_v30  ;;  %v3510_v17 = vld [vmem:[#allocation3 + $0x264] ss:$16 sps:$4 sm:$0xff]   ;;  %v3513_v18 = vld [vmem:[#allocation3 + $0x26c] ss:$16 sps:$4 sm:$0xff]   ;;  %v3508_v19 = vld [vmem:[#allocation3 + $0x260] ss:$16 sps:$4 sm:$0xff]  }
  0x45   :  { %v3511_v20 = vld [vmem:[#allocation3 + $0x268] ss:$16 sps:$4 sm:$0xff]   ;;  %v3516_v21 = vld [vmem:[#allocation3 + $0x284] ss:$16 sps:$4 sm:$0xff]   ;;  %v3519_v22 = vld [vmem:[#allocation3 + $0x28c] ss:$16 sps:$4 sm:$0xff]  }
  0x46   :  { %v3514_v23 = vld [vmem:[#allocation3 + $0x280] ss:$16 sps:$4 sm:$0xff]   ;;  %v3517_v24 = vld [vmem:[#allocation3 + $0x288] ss:$16 sps:$4 sm:$0xff]   ;;  %v3522_v25 = vld [vmem:[#allocation3 + $0x2a4] ss:$16 sps:$4 sm:$0xff]  }
  0x47   :  { %1664 = vmatpush1.bf16.msra.mxu0 %v3440_v31  ;;  %1828 = vmatpush1.bf16.msra.mxu1 %v3441_v32  ;;  %v3525_v26 = vld [vmem:[#allocation3 + $0x2ac] ss:$16 sps:$4 sm:$0xff]   ;;  %v3520_v27 = vld [vmem:[#allocation3 + $0x2a0] ss:$16 sps:$4 sm:$0xff]   ;;  %v3523_v28 = vld [vmem:[#allocation3 + $0x2a8] ss:$16 sps:$4 sm:$0xff]  }
  0x48   :  { %1665 = vmatprep.subr.bf16.mxu0 %v3442_v33  ;;  %1829 = vmatprep.subr.bf16.mxu1 %v3444_v34  ;;  %v3528_v29 = vld [vmem:[#allocation3 + $0x2c4] ss:$16 sps:$4 sm:$0xff]   ;;  %v3531_v30 = vld [vmem:[#allocation3 + $0x2cc] ss:$16 sps:$4 sm:$0xff]   ;;  %v3526_v32 = vld [vmem:[#allocation3 + $0x2c0] ss:$16 sps:$4 sm:$0xff]  }
  0x49   :  { %v78_v31 = vld [vmem:[%s4232_s0 + $0x18] sm:$0xff]  ;;  %v3550_v49 = vld [vmem:[#allocation3 + $0x340] ss:$16 sps:$4 sm:$0xff]  }
  0x4a   :  { %v86_v33 = vpack.c.bf16 %v78_v31, %v78_v31  ;;  %v3529_v34 = vld [vmem:[#allocation3 + $0x2c8] ss:$16 sps:$4 sm:$0xff]   ;;  %v3552_v47 = vld [vmem:[#allocation3 + $0x344] ss:$16 sps:$4 sm:$0xff]  }
  0x4b   :  { %1666 = vmatpush1.bf16.msra.mxu0 %v3446_v35  ;;  %1830 = vmatpush1.bf16.msra.mxu1 %v3447_v36  ;;  %v3534_v35 = vld [vmem:[#allocation3 + $0x2e4] ss:$16 sps:$4 sm:$0xff]   ;;  %v3537_v36 = vld [vmem:[#allocation3 + $0x2ec] ss:$16 sps:$4 sm:$0xff]  }
  0x4c   :  { %1667 = vmatprep.subr.bf16.mxu0 %v3448_v37  ;;  %1831 = vmatprep.subr.bf16.mxu1 %v3450_v38  ;;  %v3532_v37 = vld [vmem:[#allocation3 + $0x2e0] ss:$16 sps:$4 sm:$0xff]   ;;  %v3535_v38 = vld [vmem:[#allocation3 + $0x2e8] ss:$16 sps:$4 sm:$0xff]   ;;  %v3582_v3 = vld [vmem:[#allocation3 + $0x3e4] ss:$16 sps:$4 sm:$0xff]  }
  0x4d   :  { %v3618_v31 = vld [vmem:[#allocation3 + $0x4a4] ss:$16 sps:$4 sm:$0xff]  }
  0x4f   :  { %1668 = vmatpush1.bf16.msra.mxu0 %v3452_v39  ;;  %1832 = vmatpush1.bf16.msra.mxu1 %v3453_v40  ;;  %v3540_v39 = vld [vmem:[#allocation3 + $0x304] ss:$16 sps:$4 sm:$0xff]   ;;  %v3543_v40 = vld [vmem:[#allocation3 + $0x30c] ss:$16 sps:$4 sm:$0xff]  }
  0x50   :  { %1669 = vmatprep.subr.bf16.mxu0 %v3454_v41  ;;  %1833 = vmatprep.subr.bf16.mxu1 %v3456_v42  ;;  %v3538_v41 = vld [vmem:[#allocation3 + $0x300] ss:$16 sps:$4 sm:$0xff]   ;;  %v3541_v42 = vld [vmem:[#allocation3 + $0x308] ss:$16 sps:$4 sm:$0xff]  }
  0x53   :  { %1670 = vmatpush1.bf16.msra.mxu0 %v3458_v43  ;;  %1834 = vmatpush1.bf16.msra.mxu1 %v3459_v44  ;;  %v3546_v43 = vld [vmem:[#allocation3 + $0x324] ss:$16 sps:$4 sm:$0xff]   ;;  %v3549_v44 = vld [vmem:[#allocation3 + $0x32c] ss:$16 sps:$4 sm:$0xff]  }
  0x54   :  { %1671 = vmatprep.subr.bf16.mxu0 %v3460_v45  ;;  %1835 = vmatprep.subr.bf16.mxu1 %v3462_v46  ;;  %v3544_v45 = vld [vmem:[#allocation3 + $0x320] ss:$16 sps:$4 sm:$0xff]   ;;  %v3547_v46 = vld [vmem:[#allocation3 + $0x328] ss:$16 sps:$4 sm:$0xff]  }
  0x57   :  { %1672 = vmatpush1.bf16.msra.mxu0 %v3464_v48  ;;  %1836 = vmatpush1.bf16.msra.mxu1 %v3465_v50  ;;  %v3555_v48 = vld [vmem:[#allocation3 + $0x34c] ss:$16 sps:$4 sm:$0xff]   ;;  %v3553_v50 = vld [vmem:[#allocation3 + $0x348] ss:$16 sps:$4 sm:$0xff]  }
  0x58   :  { %1673 = vmatprep.subr.bf16.mxu0 %v3466_v51  ;;  %1837 = vmatprep.subr.bf16.mxu1 %v3468_v52  ;;  %v3558_v51 = vld [vmem:[#allocation3 + $0x364] ss:$16 sps:$4 sm:$0xff]   ;;  %v3561_v52 = vld [vmem:[#allocation3 + $0x36c] ss:$16 sps:$4 sm:$0xff]  }
  0x5b   :  { %1674 = vmatpush1.bf16.msra.mxu0 %v3470_v53  ;;  %1838 = vmatpush1.bf16.msra.mxu1 %v3471_v54  ;;  %v3556_v53 = vld [vmem:[#allocation3 + $0x360] ss:$16 sps:$4 sm:$0xff]   ;;  %v3559_v54 = vld [vmem:[#allocation3 + $0x368] ss:$16 sps:$4 sm:$0xff]  }
  0x5c   :  { %1675 = vmatprep.subr.bf16.mxu0 %v3472_v55  ;;  %1839 = vmatprep.subr.bf16.mxu1 %v3474_v56  ;;  %v3564_v55 = vld [vmem:[#allocation3 + $0x384] ss:$16 sps:$4 sm:$0xff]   ;;  %v3567_v56 = vld [vmem:[#allocation3 + $0x38c] ss:$16 sps:$4 sm:$0xff]  }
  0x5f   :  { %1676 = vmatpush1.bf16.msra.mxu0 %v3476_v57  ;;  %1840 = vmatpush1.bf16.msra.mxu1 %v3477_v58  ;;  %v3562_v57 = vld [vmem:[#allocation3 + $0x380] ss:$16 sps:$4 sm:$0xff]   ;;  %v3565_v58 = vld [vmem:[#allocation3 + $0x388] ss:$16 sps:$4 sm:$0xff]  }
  0x60   :  { %1677 = vmatprep.subr.bf16.mxu0 %v3478_v59  ;;  %1841 = vmatprep.subr.bf16.mxu1 %v3480_v60  ;;  %v3570_v59 = vld [vmem:[#allocation3 + $0x3a4] ss:$16 sps:$4 sm:$0xff]   ;;  %v3573_v60 = vld [vmem:[#allocation3 + $0x3ac] ss:$16 sps:$4 sm:$0xff]  }
  0x63   :  { %1678 = vmatpush1.bf16.msra.mxu0 %v3482_v61  ;;  %1842 = vmatpush1.bf16.msra.mxu1 %v3483_v62  ;;  %v3568_v61 = vld [vmem:[#allocation3 + $0x3a0] ss:$16 sps:$4 sm:$0xff]   ;;  %v3571_v62 = vld [vmem:[#allocation3 + $0x3a8] ss:$16 sps:$4 sm:$0xff]  }
  0x64   :  { %1679 = vmatprep.subr.bf16.mxu0 %v3484_v63  ;;  %1843 = vmatprep.subr.bf16.mxu1 %v3486_v0  ;;  %v3576_v63 = vld [vmem:[#allocation3 + $0x3c4] ss:$16 sps:$4 sm:$0xff]   ;;  %v3579_v0 = vld [vmem:[#allocation3 + $0x3cc] ss:$16 sps:$4 sm:$0xff]  }
  0x67   :  { %1680 = vmatpush1.bf16.msra.mxu0 %v3488_v1  ;;  %1844 = vmatpush1.bf16.msra.mxu1 %v3489_v2  ;;  %v3574_v1 = vld [vmem:[#allocation3 + $0x3c0] ss:$16 sps:$4 sm:$0xff]   ;;  %v3577_v2 = vld [vmem:[#allocation3 + $0x3c8] ss:$16 sps:$4 sm:$0xff]  }
  0x68   :  { %1690 = vmatprep.subr.bf16.mxu0 %v3492_v4  ;;  %1854 = vmatprep.subr.bf16.mxu1 %v3495_v5  ;;  %v3585_v4 = vld [vmem:[#allocation3 + $0x3ec] ss:$16 sps:$4 sm:$0xff]   ;;  %v3580_v5 = vld [vmem:[#allocation3 + $0x3e0] ss:$16 sps:$4 sm:$0xff]  }
  0x6a   :  { %1682 = vmatmul.mubr.bf16.vlgmr.msra.gmra.mrb[0].mxu0 %v83_v6  ;;  %1846 = vmatmul.mubr.bf16.vlgmr.msra.gmra.mrb[0].mxu1 %v83_v6  ;;  %v3583_v6 = vld [vmem:[#allocation3 + $0x3e8] ss:$16 sps:$4 sm:$0xff]  }
  0x6b   :  { %1691 = vmatpush1.bf16.msra.mxu0 %v3490_v7  ;;  %1855 = vmatpush1.bf16.msra.mxu1 %v3493_v8  ;;  %v3588_v7 = vld [vmem:[#allocation3 + $0x404] ss:$16 sps:$4 sm:$0xff]  }
  0x6c   :  { %1692 = vmatprep.subr.bf16.mxu0 %v3498_v9  ;;  %1856 = vmatprep.subr.bf16.mxu1 %v3501_v10  ;;  %v77_v8 = vld [vmem:[%s4232_s0 + $0x10] sm:$0xff] }
  0x6d   :  { %1722 = vmatprep.mubr.bf16.mxu0 %v86_v33  ;;  %1886 = vmatprep.mubr.bf16.mxu1 %v86_v33  ;;  %v3591_v9 = vld [vmem:[#allocation3 + $0x40c] ss:$16 sps:$4 sm:$0xff]   ;;  %v3586_v10 = vld [vmem:[#allocation3 + $0x400] ss:$16 sps:$4 sm:$0xff]  }
  0x6e   :  { %v3616_v33 = vld [vmem:[#allocation3 + $0x4a0] ss:$16 sps:$4 sm:$0xff]  }
  0x6f   :  { %1693 = vmatpush1.bf16.msra.mxu0 %v3496_v11  ;;  %1857 = vmatpush1.bf16.msra.mxu1 %v3499_v12  ;;  %v3589_v11 = vld [vmem:[#allocation3 + $0x408] ss:$16 sps:$4 sm:$0xff]   ;;  %v85_v12 = vpack.c.bf16 %v77_v8, %v77_v8  ;;  %v3681_v8 = vld [vmem:[#allocation3 + $0x5ec] ss:$16 sps:$4 sm:$0xff]  }
  0x70   :  { %1694 = vmatprep.subr.bf16.mxu0 %v3504_v13  ;;  %1858 = vmatprep.subr.bf16.mxu1 %v3507_v14  ;;  %v3594_v13 = vld [vmem:[#allocation3 + $0x424] ss:$16 sps:$4 sm:$0xff]   ;;  %v3597_v14 = vld [vmem:[#allocation3 + $0x42c] ss:$16 sps:$4 sm:$0xff]  }
  0x73   :  { %1695 = vmatpush1.bf16.msra.mxu0 %v3502_v15  ;;  %1859 = vmatpush1.bf16.msra.mxu1 %v3505_v16  ;;  %v80_v15 = vld [vmem:[%s4232_s0 + $0x28] sm:$0xff] }
  0x74   :  { %1696 = vmatprep.subr.bf16.mxu0 %v3510_v17  ;;  %1860 = vmatprep.subr.bf16.mxu1 %v3513_v18  ;;  %v88_v16 = vpack.c.bf16 %v80_v15, %v80_v15  ;;  %v3592_v17 = vld [vmem:[#allocation3 + $0x420] ss:$16 sps:$4 sm:$0xff]   ;;  %v3595_v18 = vld [vmem:[#allocation3 + $0x428] ss:$16 sps:$4 sm:$0xff]  }
  0x75   :  { %v3685_v15 = vld [vmem:[#allocation3 + $0x608] ss:$16 sps:$4 sm:$0xff]  }
  0x77   :  { %1697 = vmatpush1.bf16.msra.mxu0 %v3508_v19  ;;  %1861 = vmatpush1.bf16.msra.mxu1 %v3511_v20  ;;  %v3600_v19 = vld [vmem:[#allocation3 + $0x444] ss:$16 sps:$4 sm:$0xff]   ;;  %v3603_v20 = vld [vmem:[#allocation3 + $0x44c] ss:$16 sps:$4 sm:$0xff]  }
  0x78   :  { %1698 = vmatprep.subr.bf16.mxu0 %v3516_v21  ;;  %1862 = vmatprep.subr.bf16.mxu1 %v3519_v22  ;;  %v3598_v21 = vld [vmem:[#allocation3 + $0x440] ss:$16 sps:$4 sm:$0xff]   ;;  %v3601_v22 = vld [vmem:[#allocation3 + $0x448] ss:$16 sps:$4 sm:$0xff]  }
  0x7b   :  { %1699 = vmatpush1.bf16.msra.mxu0 %v3514_v23  ;;  %1863 = vmatpush1.bf16.msra.mxu1 %v3517_v24  ;;  %v3606_v23 = vld [vmem:[#allocation3 + $0x464] ss:$16 sps:$4 sm:$0xff]   ;;  %v3609_v24 = vld [vmem:[#allocation3 + $0x46c] ss:$16 sps:$4 sm:$0xff]  }
  0x7c   :  { %1700 = vmatprep.subr.bf16.mxu0 %v3522_v25  ;;  %1864 = vmatprep.subr.bf16.mxu1 %v3525_v26  ;;  %v3604_v25 = vld [vmem:[#allocation3 + $0x460] ss:$16 sps:$4 sm:$0xff]   ;;  %v3607_v26 = vld [vmem:[#allocation3 + $0x468] ss:$16 sps:$4 sm:$0xff]  }
  0x7f   :  { %1701 = vmatpush1.bf16.msra.mxu0 %v3520_v27  ;;  %1865 = vmatpush1.bf16.msra.mxu1 %v3523_v28  ;;  %v3612_v27 = vld [vmem:[#allocation3 + $0x484] ss:$16 sps:$4 sm:$0xff]   ;;  %v3615_v28 = vld [vmem:[#allocation3 + $0x48c] ss:$16 sps:$4 sm:$0xff]  }
  0x80   :  { %1702 = vmatprep.subr.bf16.mxu0 %v3528_v29  ;;  %1866 = vmatprep.subr.bf16.mxu1 %v3531_v30  ;;  %v3610_v29 = vld [vmem:[#allocation3 + $0x480] ss:$16 sps:$4 sm:$0xff]   ;;  %v3613_v30 = vld [vmem:[#allocation3 + $0x488] ss:$16 sps:$4 sm:$0xff]  }
  0x83   :  { %1703 = vmatpush1.bf16.msra.mxu0 %v3526_v32  ;;  %1867 = vmatpush1.bf16.msra.mxu1 %v3529_v34  ;;  %v3621_v32 = vld [vmem:[#allocation3 + $0x4ac] ss:$16 sps:$4 sm:$0xff]   ;;  %v3619_v34 = vld [vmem:[#allocation3 + $0x4a8] ss:$16 sps:$4 sm:$0xff]  }
  0x84   :  { %1704 = vmatprep.subr.bf16.mxu0 %v3534_v35  ;;  %1868 = vmatprep.subr.bf16.mxu1 %v3537_v36  ;;  %v3624_v35 = vld [vmem:[#allocation3 + $0x4c4] ss:$16 sps:$4 sm:$0xff]   ;;  %v3627_v36 = vld [vmem:[#allocation3 + $0x4cc] ss:$16 sps:$4 sm:$0xff]  }
  0x87   :  { %1705 = vmatpush1.bf16.msra.mxu0 %v3532_v37  ;;  %1869 = vmatpush1.bf16.msra.mxu1 %v3535_v38  ;;  %v3622_v37 = vld [vmem:[#allocation3 + $0x4c0] ss:$16 sps:$4 sm:$0xff]   ;;  %v3625_v38 = vld [vmem:[#allocation3 + $0x4c8] ss:$16 sps:$4 sm:$0xff]  }
  0x88   :  { %1706 = vmatprep.subr.bf16.mxu0 %v3540_v39  ;;  %1870 = vmatprep.subr.bf16.mxu1 %v3543_v40  ;;  %v3630_v39 = vld [vmem:[#allocation3 + $0x4e4] ss:$16 sps:$4 sm:$0xff]   ;;  %v3633_v40 = vld [vmem:[#allocation3 + $0x4ec] ss:$16 sps:$4 sm:$0xff]  }
  0x8b   :  { %1707 = vmatpush1.bf16.msra.mxu0 %v3538_v41  ;;  %1871 = vmatpush1.bf16.msra.mxu1 %v3541_v42  ;;  %v3628_v41 = vld [vmem:[#allocation3 + $0x4e0] ss:$16 sps:$4 sm:$0xff]   ;;  %v3631_v42 = vld [vmem:[#allocation3 + $0x4e8] ss:$16 sps:$4 sm:$0xff]  }
  0x8c   :  { %1708 = vmatprep.subr.bf16.mxu0 %v3546_v43  ;;  %1872 = vmatprep.subr.bf16.mxu1 %v3549_v44  ;;  %v3636_v43 = vld [vmem:[#allocation3 + $0x504] ss:$16 sps:$4 sm:$0xff]   ;;  %v3639_v44 = vld [vmem:[#allocation3 + $0x50c] ss:$16 sps:$4 sm:$0xff]  }
  0x8f   :  { %1709 = vmatpush1.bf16.msra.mxu0 %v3544_v45  ;;  %1873 = vmatpush1.bf16.msra.mxu1 %v3547_v46  ;;  %v3634_v45 = vld [vmem:[#allocation3 + $0x500] ss:$16 sps:$4 sm:$0xff]   ;;  %v3637_v46 = vld [vmem:[#allocation3 + $0x508] ss:$16 sps:$4 sm:$0xff]  }
  0x90   :  { %1710 = vmatprep.subr.bf16.mxu0 %v3552_v47  ;;  %1874 = vmatprep.subr.bf16.mxu1 %v3555_v48  ;;  %v3642_v47 = vld [vmem:[#allocation3 + $0x524] ss:$16 sps:$4 sm:$0xff]   ;;  %v3645_v48 = vld [vmem:[#allocation3 + $0x52c] ss:$16 sps:$4 sm:$0xff]  }
  0x93   :  { %1711 = vmatpush1.bf16.msra.mxu0 %v3550_v49  ;;  %1875 = vmatpush1.bf16.msra.mxu1 %v3553_v50  ;;  %v3640_v49 = vld [vmem:[#allocation3 + $0x520] ss:$16 sps:$4 sm:$0xff]   ;;  %v3643_v50 = vld [vmem:[#allocation3 + $0x528] ss:$16 sps:$4 sm:$0xff]  }
  0x94   :  { %1712 = vmatprep.subr.bf16.mxu0 %v3558_v51  ;;  %1876 = vmatprep.subr.bf16.mxu1 %v3561_v52  ;;  %v3648_v51 = vld [vmem:[#allocation3 + $0x544] ss:$16 sps:$4 sm:$0xff]   ;;  %v3651_v52 = vld [vmem:[#allocation3 + $0x54c] ss:$16 sps:$4 sm:$0xff]  }
  0x97   :  { %1713 = vmatpush1.bf16.msra.mxu0 %v3556_v53  ;;  %1877 = vmatpush1.bf16.msra.mxu1 %v3559_v54  ;;  %v3646_v53 = vld [vmem:[#allocation3 + $0x540] ss:$16 sps:$4 sm:$0xff]   ;;  %v3649_v54 = vld [vmem:[#allocation3 + $0x548] ss:$16 sps:$4 sm:$0xff]  }
  0x98   :  { %1714 = vmatprep.subr.bf16.mxu0 %v3564_v55  ;;  %1878 = vmatprep.subr.bf16.mxu1 %v3567_v56  ;;  %v3654_v55 = vld [vmem:[#allocation3 + $0x564] ss:$16 sps:$4 sm:$0xff]   ;;  %v3657_v56 = vld [vmem:[#allocation3 + $0x56c] ss:$16 sps:$4 sm:$0xff]  }
  0x9b   :  { %1715 = vmatpush1.bf16.msra.mxu0 %v3562_v57  ;;  %1879 = vmatpush1.bf16.msra.mxu1 %v3565_v58  ;;  %v3652_v57 = vld [vmem:[#allocation3 + $0x560] ss:$16 sps:$4 sm:$0xff]   ;;  %v3655_v58 = vld [vmem:[#allocation3 + $0x568] ss:$16 sps:$4 sm:$0xff]  }
  0x9c   :  { %1716 = vmatprep.subr.bf16.mxu0 %v3570_v59  ;;  %1880 = vmatprep.subr.bf16.mxu1 %v3573_v60  ;;  %v3660_v59 = vld [vmem:[#allocation3 + $0x584] ss:$16 sps:$4 sm:$0xff]   ;;  %v3663_v60 = vld [vmem:[#allocation3 + $0x58c] ss:$16 sps:$4 sm:$0xff]  }
  0x9f   :  { %1717 = vmatpush1.bf16.msra.mxu0 %v3568_v61  ;;  %1881 = vmatpush1.bf16.msra.mxu1 %v3571_v62  ;;  %v3658_v61 = vld [vmem:[#allocation3 + $0x580] ss:$16 sps:$4 sm:$0xff]   ;;  %v3661_v62 = vld [vmem:[#allocation3 + $0x588] ss:$16 sps:$4 sm:$0xff]  }
  0xa0   :  { %1718 = vmatprep.subr.bf16.mxu0 %v3576_v63  ;;  %1882 = vmatprep.subr.bf16.mxu1 %v3579_v0  ;;  %v3666_v63 = vld [vmem:[#allocation3 + $0x5a4] ss:$16 sps:$4 sm:$0xff]   ;;  %v3669_v0 = vld [vmem:[#allocation3 + $0x5ac] ss:$16 sps:$4 sm:$0xff]  }
  0xa3   :  { %1719 = vmatpush1.bf16.msra.mxu0 %v3574_v1  ;;  %1883 = vmatpush1.bf16.msra.mxu1 %v3577_v2  ;;  %v3664_v1 = vld [vmem:[#allocation3 + $0x5a0] ss:$16 sps:$4 sm:$0xff]   ;;  %v3667_v2 = vld [vmem:[#allocation3 + $0x5a8] ss:$16 sps:$4 sm:$0xff]  }
  0xa4   :  { %1720 = vmatprep.subr.bf16.mxu0 %v3582_v3  ;;  %1884 = vmatprep.subr.bf16.mxu1 %v3585_v4  ;;  %v3672_v3 = vld [vmem:[#allocation3 + $0x5c4] ss:$16 sps:$4 sm:$0xff]   ;;  %v3675_v4 = vld [vmem:[#allocation3 + $0x5cc] ss:$16 sps:$4 sm:$0xff]  }
  0xa7   :  { %1721 = vmatpush1.bf16.msra.mxu0 %v3580_v5  ;;  %1885 = vmatpush1.bf16.msra.mxu1 %v3583_v6  ;;  %v3670_v5 = vld [vmem:[#allocation3 + $0x5c0] ss:$16 sps:$4 sm:$0xff]   ;;  %v3673_v6 = vld [vmem:[#allocation3 + $0x5c8] ss:$16 sps:$4 sm:$0xff]  }
  0xa8   :  { %1731 = vmatprep.subr.bf16.mxu0 %v3588_v7  ;;  %1895 = vmatprep.subr.bf16.mxu1 %v3591_v9  ;;  %v3678_v7 = vld [vmem:[#allocation3 + $0x5e4] ss:$16 sps:$4 sm:$0xff]   ;;  %v3676_v9 = vld [vmem:[#allocation3 + $0x5e0] ss:$16 sps:$4 sm:$0xff]  }
  0xaa   :  { %1723 = vmatmul.mubr.bf16.vlgmr.msra.gmra.mrb[0].mxu0 %v85_v12  ;;  %1887 = vmatmul.mubr.bf16.vlgmr.msra.gmra.mrb[0].mxu1 %v85_v12  ;;  %v79_v12 = vld [vmem:[%s4232_s0 + $0x20] sm:$0xff] }
  0xab   :  { %1732 = vmatpush1.bf16.msra.mxu0 %v3586_v10  ;;  %1896 = vmatpush1.bf16.msra.mxu1 %v3589_v11  ;;  %v3679_v10 = vld [vmem:[#allocation3 + $0x5e8] ss:$16 sps:$4 sm:$0xff]   ;;  %v3684_v11 = vld [vmem:[#allocation3 + $0x604] ss:$16 sps:$4 sm:$0xff]  }
  0xac   :  { %1733 = vmatprep.subr.bf16.mxu0 %v3594_v13  ;;  %1897 = vmatprep.subr.bf16.mxu1 %v3597_v14  ;;  %v3687_v13 = vld [vmem:[#allocation3 + $0x60c] ss:$16 sps:$4 sm:$0xff]   ;;  %v3682_v14 = vld [vmem:[#allocation3 + $0x600] ss:$16 sps:$4 sm:$0xff]  }
  0xad   :  { %1763 = vmatprep.mubr.bf16.mxu0 %v88_v16  ;;  %1927 = vmatprep.mubr.bf16.mxu1 %v88_v16  ;;  %v87_v16 = vpack.c.bf16 %v79_v12, %v79_v12  ;;  %v3777_v12 = vld [vmem:[#allocation3 + $0x7ec] ss:$16 sps:$4 sm:$0xff]  }
  0xaf   :  { %1734 = vmatpush1.bf16.msra.mxu0 %v3592_v17  ;;  %1898 = vmatpush1.bf16.msra.mxu1 %v3595_v18  ;;  %v3690_v17 = vld [vmem:[#allocation3 + $0x624] ss:$16 sps:$4 sm:$0xff]  }
  0xb0   :  { %1735 = vmatprep.subr.bf16.mxu0 %v3600_v19  ;;  %1899 = vmatprep.subr.bf16.mxu1 %v3603_v20  ;;  %v82_v18 = vld [vmem:[%s4232_s0 + $0x38] sm:$0xff]  ;;  %v3688_v20 = vld [vmem:[#allocation3 + $0x620] ss:$16 sps:$4 sm:$0xff]  }
  0xb1   :  { %v3693_v19 = vld [vmem:[#allocation3 + $0x62c] ss:$16 sps:$4 sm:$0xff]  }
  0xb3   :  { %1736 = vmatpush1.bf16.msra.mxu0 %v3598_v21  ;;  %1900 = vmatpush1.bf16.msra.mxu1 %v3601_v22  ;;  %v3691_v21 = vld [vmem:[#allocation3 + $0x628] ss:$16 sps:$4 sm:$0xff]   ;;  %v90_v22 = vpack.c.bf16 %v82_v18, %v82_v18 }
  0xb4   :  { %1737 = vmatprep.subr.bf16.mxu0 %v3606_v23  ;;  %1901 = vmatprep.subr.bf16.mxu1 %v3609_v24  ;;  %v3696_v23 = vld [vmem:[#allocation3 + $0x644] ss:$16 sps:$4 sm:$0xff]   ;;  %v3699_v24 = vld [vmem:[#allocation3 + $0x64c] ss:$16 sps:$4 sm:$0xff]   ;;  %v3778_v18 = vld [vmem:[#allocation5] ss:$8 sps:$4 sm:$0xff]  }
  0xb7   :  { %1738 = vmatpush1.bf16.msra.mxu0 %v3604_v25  ;;  %1902 = vmatpush1.bf16.msra.mxu1 %v3607_v26  ;;  %v3694_v25 = vld [vmem:[#allocation3 + $0x640] ss:$16 sps:$4 sm:$0xff]   ;;  %v3697_v26 = vld [vmem:[#allocation3 + $0x648] ss:$16 sps:$4 sm:$0xff]  }
  0xb8   :  { %1739 = vmatprep.subr.bf16.mxu0 %v3612_v27  ;;  %1903 = vmatprep.subr.bf16.mxu1 %v3615_v28  ;;  %v3702_v27 = vld [vmem:[#allocation3 + $0x664] ss:$16 sps:$4 sm:$0xff]   ;;  %v3705_v28 = vld [vmem:[#allocation3 + $0x66c] ss:$16 sps:$4 sm:$0xff]  }
  0xbb   :  { %1740 = vmatpush1.bf16.msra.mxu0 %v3610_v29  ;;  %1904 = vmatpush1.bf16.msra.mxu1 %v3613_v30  ;;  %v3700_v29 = vld [vmem:[#allocation3 + $0x660] ss:$16 sps:$4 sm:$0xff]   ;;  %v3703_v30 = vld [vmem:[#allocation3 + $0x668] ss:$16 sps:$4 sm:$0xff]  }
  0xbc   :  { %1741 = vmatprep.subr.bf16.mxu0 %v3618_v31  ;;  %1905 = vmatprep.subr.bf16.mxu1 %v3621_v32  ;;  %v3708_v31 = vld [vmem:[#allocation3 + $0x684] ss:$16 sps:$4 sm:$0xff]   ;;  %v3711_v32 = vld [vmem:[#allocation3 + $0x68c] ss:$16 sps:$4 sm:$0xff]  }
  0xbf   :  { %1742 = vmatpush1.bf16.msra.mxu0 %v3616_v33  ;;  %1906 = vmatpush1.bf16.msra.mxu1 %v3619_v34  ;;  %v3706_v33 = vld [vmem:[#allocation3 + $0x680] ss:$16 sps:$4 sm:$0xff]   ;;  %v3709_v34 = vld [vmem:[#allocation3 + $0x688] ss:$16 sps:$4 sm:$0xff]  }
  0xc0   :  { %1743 = vmatprep.subr.bf16.mxu0 %v3624_v35  ;;  %1907 = vmatprep.subr.bf16.mxu1 %v3627_v36  ;;  %v3714_v35 = vld [vmem:[#allocation3 + $0x6a4] ss:$16 sps:$4 sm:$0xff]   ;;  %v3717_v36 = vld [vmem:[#allocation3 + $0x6ac] ss:$16 sps:$4 sm:$0xff]  }
  0xc3   :  { %1744 = vmatpush1.bf16.msra.mxu0 %v3622_v37  ;;  %1908 = vmatpush1.bf16.msra.mxu1 %v3625_v38  ;;  %v3712_v37 = vld [vmem:[#allocation3 + $0x6a0] ss:$16 sps:$4 sm:$0xff]   ;;  %v3715_v38 = vld [vmem:[#allocation3 + $0x6a8] ss:$16 sps:$4 sm:$0xff]  }
  0xc4   :  { %1745 = vmatprep.subr.bf16.mxu0 %v3630_v39  ;;  %1909 = vmatprep.subr.bf16.mxu1 %v3633_v40  ;;  %v3720_v39 = vld [vmem:[#allocation3 + $0x6c4] ss:$16 sps:$4 sm:$0xff]   ;;  %v3723_v40 = vld [vmem:[#allocation3 + $0x6cc] ss:$16 sps:$4 sm:$0xff]  }
  0xc7   :  { %1746 = vmatpush1.bf16.msra.mxu0 %v3628_v41  ;;  %1910 = vmatpush1.bf16.msra.mxu1 %v3631_v42  ;;  %v3718_v41 = vld [vmem:[#allocation3 + $0x6c0] ss:$16 sps:$4 sm:$0xff]   ;;  %v3721_v42 = vld [vmem:[#allocation3 + $0x6c8] ss:$16 sps:$4 sm:$0xff]  }
  0xc8   :  { %1747 = vmatprep.subr.bf16.mxu0 %v3636_v43  ;;  %1911 = vmatprep.subr.bf16.mxu1 %v3639_v44  ;;  %v3726_v43 = vld [vmem:[#allocation3 + $0x6e4] ss:$16 sps:$4 sm:$0xff]   ;;  %v3729_v44 = vld [vmem:[#allocation3 + $0x6ec] ss:$16 sps:$4 sm:$0xff]  }
  0xcb   :  { %1748 = vmatpush1.bf16.msra.mxu0 %v3634_v45  ;;  %1912 = vmatpush1.bf16.msra.mxu1 %v3637_v46  ;;  %v3724_v45 = vld [vmem:[#allocation3 + $0x6e0] ss:$16 sps:$4 sm:$0xff]   ;;  %v3727_v46 = vld [vmem:[#allocation3 + $0x6e8] ss:$16 sps:$4 sm:$0xff]  }
  0xcc   :  { %1749 = vmatprep.subr.bf16.mxu0 %v3642_v47  ;;  %1913 = vmatprep.subr.bf16.mxu1 %v3645_v48  ;;  %v3732_v47 = vld [vmem:[#allocation3 + $0x704] ss:$16 sps:$4 sm:$0xff]   ;;  %v3735_v48 = vld [vmem:[#allocation3 + $0x70c] ss:$16 sps:$4 sm:$0xff]  }
  0xcf   :  { %1750 = vmatpush1.bf16.msra.mxu0 %v3640_v49  ;;  %1914 = vmatpush1.bf16.msra.mxu1 %v3643_v50  ;;  %v3730_v49 = vld [vmem:[#allocation3 + $0x700] ss:$16 sps:$4 sm:$0xff]   ;;  %v3733_v50 = vld [vmem:[#allocation3 + $0x708] ss:$16 sps:$4 sm:$0xff]  }
  0xd0   :  { %1751 = vmatprep.subr.bf16.mxu0 %v3648_v51  ;;  %1915 = vmatprep.subr.bf16.mxu1 %v3651_v52  ;;  %v3738_v51 = vld [vmem:[#allocation3 + $0x724] ss:$16 sps:$4 sm:$0xff]   ;;  %v3741_v52 = vld [vmem:[#allocation3 + $0x72c] ss:$16 sps:$4 sm:$0xff]  }
  0xd3   :  { %1752 = vmatpush1.bf16.msra.mxu0 %v3646_v53  ;;  %1916 = vmatpush1.bf16.msra.mxu1 %v3649_v54  ;;  %v3736_v53 = vld [vmem:[#allocation3 + $0x720] ss:$16 sps:$4 sm:$0xff]   ;;  %v3739_v54 = vld [vmem:[#allocation3 + $0x728] ss:$16 sps:$4 sm:$0xff]  }
  0xd4   :  { %1753 = vmatprep.subr.bf16.mxu0 %v3654_v55  ;;  %1917 = vmatprep.subr.bf16.mxu1 %v3657_v56  ;;  %v3744_v55 = vld [vmem:[#allocation3 + $0x744] ss:$16 sps:$4 sm:$0xff]   ;;  %v3747_v56 = vld [vmem:[#allocation3 + $0x74c] ss:$16 sps:$4 sm:$0xff]  }
  0xd7   :  { %1754 = vmatpush1.bf16.msra.mxu0 %v3652_v57  ;;  %1918 = vmatpush1.bf16.msra.mxu1 %v3655_v58  ;;  %v3742_v57 = vld [vmem:[#allocation3 + $0x740] ss:$16 sps:$4 sm:$0xff]   ;;  %v3745_v58 = vld [vmem:[#allocation3 + $0x748] ss:$16 sps:$4 sm:$0xff]  }
  0xd8   :  { %1755 = vmatprep.subr.bf16.mxu0 %v3660_v59  ;;  %1919 = vmatprep.subr.bf16.mxu1 %v3663_v60  ;;  %v3750_v59 = vld [vmem:[#allocation3 + $0x764] ss:$16 sps:$4 sm:$0xff]   ;;  %v3753_v60 = vld [vmem:[#allocation3 + $0x76c] ss:$16 sps:$4 sm:$0xff]  }
  0xdb   :  { %1756 = vmatpush1.bf16.msra.mxu0 %v3658_v61  ;;  %1920 = vmatpush1.bf16.msra.mxu1 %v3661_v62  ;;  %v3748_v61 = vld [vmem:[#allocation3 + $0x760] ss:$16 sps:$4 sm:$0xff]   ;;  %v3751_v62 = vld [vmem:[#allocation3 + $0x768] ss:$16 sps:$4 sm:$0xff]  }
  0xdc   :  { %1757 = vmatprep.subr.bf16.mxu0 %v3666_v63  ;;  %1921 = vmatprep.subr.bf16.mxu1 %v3669_v0  ;;  %v3756_v63 = vld [vmem:[#allocation3 + $0x784] ss:$16 sps:$4 sm:$0xff]   ;;  %v3759_v0 = vld [vmem:[#allocation3 + $0x78c] ss:$16 sps:$4 sm:$0xff]  }
  0xdf   :  { %1758 = vmatpush1.bf16.msra.mxu0 %v3664_v1  ;;  %1922 = vmatpush1.bf16.msra.mxu1 %v3667_v2  ;;  %v3754_v1 = vld [vmem:[#allocation3 + $0x780] ss:$16 sps:$4 sm:$0xff]   ;;  %v3757_v2 = vld [vmem:[#allocation3 + $0x788] ss:$16 sps:$4 sm:$0xff]  }
  0xe0   :  { %1759 = vmatprep.subr.bf16.mxu0 %v3672_v3  ;;  %1923 = vmatprep.subr.bf16.mxu1 %v3675_v4  ;;  %v3762_v3 = vld [vmem:[#allocation3 + $0x7a4] ss:$16 sps:$4 sm:$0xff]   ;;  %v3765_v4 = vld [vmem:[#allocation3 + $0x7ac] ss:$16 sps:$4 sm:$0xff]  }
  0xe3   :  { %1760 = vmatpush1.bf16.msra.mxu0 %v3670_v5  ;;  %1924 = vmatpush1.bf16.msra.mxu1 %v3673_v6  ;;  %v3760_v5 = vld [vmem:[#allocation3 + $0x7a0] ss:$16 sps:$4 sm:$0xff]   ;;  %v3763_v6 = vld [vmem:[#allocation3 + $0x7a8] ss:$16 sps:$4 sm:$0xff]  }
  0xe4   :  { %1761 = vmatprep.subr.bf16.mxu0 %v3678_v7  ;;  %1925 = vmatprep.subr.bf16.mxu1 %v3681_v8  ;;  %v3768_v7 = vld [vmem:[#allocation3 + $0x7c4] ss:$16 sps:$4 sm:$0xff]   ;;  %v3771_v8 = vld [vmem:[#allocation3 + $0x7cc] ss:$16 sps:$4 sm:$0xff]  }
  0xe7   :  { %1762 = vmatpush1.bf16.msra.mxu0 %v3676_v9  ;;  %1926 = vmatpush1.bf16.msra.mxu1 %v3679_v10  ;;  %v3766_v9 = vld [vmem:[#allocation3 + $0x7c0] ss:$16 sps:$4 sm:$0xff]   ;;  %v3769_v10 = vld [vmem:[#allocation3 + $0x7c8] ss:$16 sps:$4 sm:$0xff]  }
  0xe8   :  { %1772 = vmatprep.subr.bf16.mxu0 %v3684_v11  ;;  %1936 = vmatprep.subr.bf16.mxu1 %v3687_v13  ;;  %v3774_v11 = vld [vmem:[#allocation3 + $0x7e4] ss:$16 sps:$4 sm:$0xff]   ;;  %v3772_v13 = vld [vmem:[#allocation3 + $0x7e0] ss:$16 sps:$4 sm:$0xff]  }
  0xea   :  { %1764 = vmatmul.mubr.bf16.vlgmr.msra.gmra.mrb[0].mxu0 %v87_v16  ;;  %1928 = vmatmul.mubr.bf16.vlgmr.msra.gmra.mrb[0].mxu1 %v87_v16  ;;  %v3780_v16 = vld [vmem:[#allocation5 + $0x4] ss:$8 sps:$4 sm:$0xff]  }
  0xeb   :  { %1773 = vmatpush1.bf16.msra.mxu0 %v3682_v14  ;;  %1937 = vmatpush1.bf16.msra.mxu1 %v3685_v15  ;;  %v3775_v14 = vld [vmem:[#allocation3 + $0x7e8] ss:$16 sps:$4 sm:$0xff]   ;;  %v81_v15 = vld [vmem:[%s4232_s0 + $0x30] sm:$0xff] }
  0xec   :  { %1774 = vmatprep.subr.bf16.mxu0 %v3690_v17  ;;  %1938 = vmatprep.subr.bf16.mxu1 %v3693_v19  ;;  %v89_v17 = vpack.c.bf16 %v81_v15, %v81_v15  ;;  %v3783_v19 = vld [vmem:[#allocation5 + $0x14] ss:$8 sps:$4 sm:$0xff]  }
  0xed   :  { %1804 = vmatprep.mubr.bf16.mxu0 %v90_v22  ;;  %1968 = vmatprep.mubr.bf16.mxu1 %v90_v22  ;;  %v3784_v22 = vld [vmem:[#allocation5 + $0x20] ss:$8 sps:$4 sm:$0xff]  }
  0xef   :  { %1775 = vmatpush1.bf16.msra.mxu0 %v3688_v20  ;;  %1939 = vmatpush1.bf16.msra.mxu1 %v3691_v21  ;;  %v3781_v20 = vld [vmem:[#allocation5 + $0x10] ss:$8 sps:$4 sm:$0xff]   ;;  %v3786_v21 = vld [vmem:[#allocation5 + $0x24] ss:$8 sps:$4 sm:$0xff]  }
  0xf0   :  { %1776 = vmatprep.subr.bf16.mxu0 %v3696_v23  ;;  %1940 = vmatprep.subr.bf16.mxu1 %v3699_v24  ;;  %v3789_v23 = vld [vmem:[#allocation5 + $0x34] ss:$8 sps:$4 sm:$0xff]   ;;  %v3787_v24 = vld [vmem:[#allocation5 + $0x30] ss:$8 sps:$4 sm:$0xff]  }
  0xf3   :  { %1777 = vmatpush1.bf16.msra.mxu0 %v3694_v25  ;;  %1941 = vmatpush1.bf16.msra.mxu1 %v3697_v26  ;;  %v3792_v25 = vld [vmem:[#allocation5 + $0x44] ss:$8 sps:$4 sm:$0xff]   ;;  %v3790_v26 = vld [vmem:[#allocation5 + $0x40] ss:$8 sps:$4 sm:$0xff]  }
  0xf4   :  { %1778 = vmatprep.subr.bf16.mxu0 %v3702_v27  ;;  %1942 = vmatprep.subr.bf16.mxu1 %v3705_v28  ;;  %v3795_v27 = vld [vmem:[#allocation5 + $0x54] ss:$8 sps:$4 sm:$0xff]   ;;  %v3793_v28 = vld [vmem:[#allocation5 + $0x50] ss:$8 sps:$4 sm:$0xff]  }
  0xf7   :  { %1779 = vmatpush1.bf16.msra.mxu0 %v3700_v29  ;;  %1943 = vmatpush1.bf16.msra.mxu1 %v3703_v30  ;;  %v3798_v29 = vld [vmem:[#allocation5 + $0x64] ss:$8 sps:$4 sm:$0xff]   ;;  %v3796_v30 = vld [vmem:[#allocation5 + $0x60] ss:$8 sps:$4 sm:$0xff]  }
  0xf8   :  { %1780 = vmatprep.subr.bf16.mxu0 %v3708_v31  ;;  %1944 = vmatprep.subr.bf16.mxu1 %v3711_v32  ;;  %v3801_v31 = vld [vmem:[#allocation5 + $0x74] ss:$8 sps:$4 sm:$0xff]   ;;  %v3799_v32 = vld [vmem:[#allocation5 + $0x70] ss:$8 sps:$4 sm:$0xff]  }
  0xfb   :  { %1781 = vmatpush1.bf16.msra.mxu0 %v3706_v33  ;;  %1945 = vmatpush1.bf16.msra.mxu1 %v3709_v34  ;;  %v3804_v33 = vld [vmem:[#allocation5 + $0x84] ss:$8 sps:$4 sm:$0xff]   ;;  %v3802_v34 = vld [vmem:[#allocation5 + $0x80] ss:$8 sps:$4 sm:$0xff]  }
  0xfc   :  { %1782 = vmatprep.subr.bf16.mxu0 %v3714_v35  ;;  %1946 = vmatprep.subr.bf16.mxu1 %v3717_v36  ;;  %v3807_v35 = vld [vmem:[#allocation5 + $0x94] ss:$8 sps:$4 sm:$0xff]   ;;  %v3805_v36 = vld [vmem:[#allocation5 + $0x90] ss:$8 sps:$4 sm:$0xff]  }
  0xff   :  { %1783 = vmatpush1.bf16.msra.mxu0 %v3712_v37  ;;  %1947 = vmatpush1.bf16.msra.mxu1 %v3715_v38  ;;  %v3810_v37 = vld [vmem:[#allocation5 + $0xa4] ss:$8 sps:$4 sm:$0xff]   ;;  %v3808_v38 = vld [vmem:[#allocation5 + $0xa0] ss:$8 sps:$4 sm:$0xff]  }
 0x100   :  { %1784 = vmatprep.subr.bf16.mxu0 %v3720_v39  ;;  %1948 = vmatprep.subr.bf16.mxu1 %v3723_v40  ;;  %v3813_v39 = vld [vmem:[#allocation5 + $0xb4] ss:$8 sps:$4 sm:$0xff]   ;;  %v3811_v40 = vld [vmem:[#allocation5 + $0xb0] ss:$8 sps:$4 sm:$0xff]  }
 0x103   :  { %1785 = vmatpush1.bf16.msra.mxu0 %v3718_v41  ;;  %1949 = vmatpush1.bf16.msra.mxu1 %v3721_v42  ;;  %v3816_v41 = vld [vmem:[#allocation5 + $0xc4] ss:$8 sps:$4 sm:$0xff]   ;;  %v3814_v42 = vld [vmem:[#allocation5 + $0xc0] ss:$8 sps:$4 sm:$0xff]  }
 0x104   :  { %1786 = vmatprep.subr.bf16.mxu0 %v3726_v43  ;;  %1950 = vmatprep.subr.bf16.mxu1 %v3729_v44  ;;  %v3819_v43 = vld [vmem:[#allocation5 + $0xd4] ss:$8 sps:$4 sm:$0xff]   ;;  %v3817_v44 = vld [vmem:[#allocation5 + $0xd0] ss:$8 sps:$4 sm:$0xff]  }
 0x107   :  { %1787 = vmatpush1.bf16.msra.mxu0 %v3724_v45  ;;  %1951 = vmatpush1.bf16.msra.mxu1 %v3727_v46  ;;  %v3822_v45 = vld [vmem:[#allocation5 + $0xe4] ss:$8 sps:$4 sm:$0xff]   ;;  %v3820_v46 = vld [vmem:[#allocation5 + $0xe0] ss:$8 sps:$4 sm:$0xff]  }
 0x108   :  { %1788 = vmatprep.subr.bf16.mxu0 %v3732_v47  ;;  %1952 = vmatprep.subr.bf16.mxu1 %v3735_v48  ;;  %v3825_v47 = vld [vmem:[#allocation5 + $0xf4] ss:$8 sps:$4 sm:$0xff]   ;;  %v3823_v48 = vld [vmem:[#allocation5 + $0xf0] ss:$8 sps:$4 sm:$0xff]  }
 0x10b   :  { %1789 = vmatpush1.bf16.msra.mxu0 %v3730_v49  ;;  %1953 = vmatpush1.bf16.msra.mxu1 %v3733_v50  ;;  %v3828_v49 = vld [vmem:[#allocation5 + $0x104] ss:$8 sps:$4 sm:$0xff]  }
 0x10c   :  { %1790 = vmatprep.subr.bf16.mxu0 %v3738_v51  ;;  %1954 = vmatprep.subr.bf16.mxu1 %v3741_v52  ;;  %v3874_v50 = vld [vmem:[%s4237_s5 + $0x40] sm:$0xff]   ;;  %v3876_v52 = vld [vmem:[%s4237_s5 + $0x48] sm:$0xff]  }
 0x10d   :  { %v3875_v51 = vld [vmem:[%s4237_s5] sm:$0xff]  }
 0x10f   :  { %1791 = vmatpush1.bf16.msra.mxu0 %v3736_v53  ;;  %1955 = vmatpush1.bf16.msra.mxu1 %v3739_v54  ;;  %v3877_v53 = vld [vmem:[%s4237_s5 + $0x8] sm:$0xff]   ;;  %v3878_v54 = vld [vmem:[%s4237_s5 + $0x50] sm:$0xff]  }
 0x110   :  { %1792 = vmatprep.subr.bf16.mxu0 %v3744_v55  ;;  %1956 = vmatprep.subr.bf16.mxu1 %v3747_v56  ;;  %v3879_v55 = vld [vmem:[%s4237_s5 + $0x10] sm:$0xff]   ;;  %v3880_v56 = vld [vmem:[%s4237_s5 + $0x58] sm:$0xff]  }
 0x113   :  { %1793 = vmatpush1.bf16.msra.mxu0 %v3742_v57  ;;  %1957 = vmatpush1.bf16.msra.mxu1 %v3745_v58  ;;  %v3881_v57 = vld [vmem:[%s4237_s5 + $0x18] sm:$0xff]   ;;  %v3882_v58 = vld [vmem:[%s4237_s5 + $0x60] sm:$0xff]  }
 0x114   :  { %1794 = vmatprep.subr.bf16.mxu0 %v3750_v59  ;;  %1958 = vmatprep.subr.bf16.mxu1 %v3753_v60  ;;  %v3883_v59 = vld [vmem:[%s4237_s5 + $0x20] sm:$0xff]   ;;  %v3884_v60 = vld [vmem:[%s4237_s5 + $0x68] sm:$0xff]  }
 0x117   :  { %1795 = vmatpush1.bf16.msra.mxu0 %v3748_v61  ;;  %1959 = vmatpush1.bf16.msra.mxu1 %v3751_v62  ;;  %v3885_v61 = vld [vmem:[%s4237_s5 + $0x28] sm:$0xff]   ;;  %v349_v62 = vlaneseq }
 0x118   :  { %1796 = vmatprep.subr.bf16.mxu0 %v3756_v63  ;;  %1960 = vmatprep.subr.bf16.mxu1 %v3759_v0 }
 0x119   :  { %v4117_v63 = vshrl.u32 %v349_v62, 7  ;;  %v3888_v62 = vld [vmem:[%s4237_s5 + $0x78] sm:$0xff]  }
 0x11b   :  { %1797 = vmatpush1.bf16.msra.mxu0 %v3754_v1  ;;  %1961 = vmatpush1.bf16.msra.mxu1 %v3757_v2  ;;  %v351_v0 = vsub.s32 0, %v4117_v63  ;;  %v4123_v1 = vld [vmem:[%s4234_s2] sm:$0xf]  ;;  %v355_v2 = vsub.s32 1, %v4117_v63 }
 0x11c   :  { %1798 = vmatprep.subr.bf16.mxu0 %v3762_v3  ;;  %1962 = vmatprep.subr.bf16.mxu1 %v3765_v4  ;;  %v363_v3 = vsub.s32 3, %v4117_v63 }
 0x11d   :  { %v352_v4 = vrot.slane %v4123_v1, %v351_v0 }
 0x11f   :  { %1799 = vmatpush1.bf16.msra.mxu0 %v3760_v5  ;;  %1963 = vmatpush1.bf16.msra.mxu1 %v3763_v6  ;;  %v356_v5 = vrot.slane %v4123_v1, %v355_v2  ;;  %v364_v6 = vrot.slane %v4123_v1, %v363_v3  ;;  %v3958_v3 = vmov 0.0  }
 0x120   :  { %1800 = vmatprep.subr.bf16.mxu0 %v3768_v7  ;;  %1964 = vmatprep.subr.bf16.mxu1 %v3771_v8 }
 0x123   :  { %1801 = vmatpush1.bf16.msra.mxu0 %v3766_v9  ;;  %1965 = vmatpush1.bf16.msra.mxu1 %v3769_v10 }
 0x124   :  { %1802 = vmatprep.subr.bf16.mxu0 %v3774_v11  ;;  %1966 = vmatprep.subr.bf16.mxu1 %v3777_v12 }
 0x127   :  { %1803 = vmatpush1.bf16.msra.mxu0 %v3772_v13  ;;  %1967 = vmatpush1.bf16.msra.mxu1 %v3775_v14 }
 0x128   :  { %2381 = vmatprep.subr.bf16.mxu0 %v3780_v16  ;;  %3273 = vmatprep.subr.bf16.mxu1 %v3874_v50  ;;  %v3867_v50 = vld [vmem:[#allocation5 + $0x1d4] ss:$8 sps:$4 sm:$0xff]  }
 0x12a   :  { %1805 = vmatmul.mubr.bf16.vlgmr.msra.gmra.mrb[0].mxu0 %v89_v17  ;;  %1969 = vmatmul.mubr.bf16.vlgmr.msra.gmra.mrb[0].mxu1 %v89_v17 }
 0x12b   :  { %2382 = vmatpush1.bf16.msra.mxu0 %v3778_v18  ;;  %3274 = vmatpush3.bf16.msra.mxu1 %v3875_v51  ;;  %v3865_v51 = vld [vmem:[#allocation5 + $0x1d0] ss:$8 sps:$4 sm:$0xff]  }
 0x12c   :  { %2383 = vmatprep.subr.bf16.mxu0 %v3783_v19  ;;  %3275 = vmatprep.subr.bf16.mxu1 %v3876_v52 }
 0x12f   :  { %2384 = vmatpush1.bf16.msra.mxu0 %v3781_v20  ;;  %3276 = vmatpush3.bf16.msra.mxu1 %v3877_v53  ;;  %v3870_v53 = vld [vmem:[#allocation5 + $0x1e4] ss:$8 sps:$4 sm:$0xff]  }
 0x130   :  { %2385 = vmatprep.subr.bf16.mxu0 %v3786_v21  ;;  %3277 = vmatprep.subr.bf16.mxu1 %v3878_v54  ;;  %v3868_v54 = vld [vmem:[#allocation5 + $0x1e0] ss:$8 sps:$4 sm:$0xff]  }
 0x133   :  { %2386 = vmatpush1.bf16.msra.mxu0 %v3784_v22  ;;  %3278 = vmatpush3.bf16.msra.mxu1 %v3879_v55  ;;  %v3826_v22 = vld [vmem:[#allocation5 + $0x100] ss:$8 sps:$4 sm:$0xff]  }
 0x134   :  { %2387 = vmatprep.subr.bf16.mxu0 %v3789_v23  ;;  %3279 = vmatprep.subr.bf16.mxu1 %v3880_v56  ;;  %v3873_v56 = vld [vmem:[#allocation5 + $0x1f4] ss:$8 sps:$4 sm:$0xff]  }
 0x137   :  { %2388 = vmatpush1.bf16.msra.mxu0 %v3787_v24  ;;  %3280 = vmatpush3.bf16.msra.mxu1 %v3881_v57  ;;  %v3831_v24 = vld [vmem:[#allocation5 + $0x114] ss:$8 sps:$4 sm:$0xff]   ;;  %v3871_v57 = vld [vmem:[#allocation5 + $0x1f0] ss:$8 sps:$4 sm:$0xff]  }
 0x138   :  { %2389 = vmatprep.subr.bf16.mxu0 %v3792_v25  ;;  %3281 = vmatprep.subr.bf16.mxu1 %v3882_v58 }
 0x13b   :  { %2390 = vmatpush1.bf16.msra.mxu0 %v3790_v26  ;;  %3282 = vmatpush3.bf16.msra.mxu1 %v3883_v59  ;;  %v3829_v26 = vld [vmem:[#allocation5 + $0x110] ss:$8 sps:$4 sm:$0xff]  }
 0x13c   :  { %2391 = vmatprep.subr.bf16.mxu0 %v3795_v27  ;;  %3283 = vmatprep.subr.bf16.mxu1 %v3884_v60  ;;  %v3834_v27 = vld [vmem:[#allocation5 + $0x124] ss:$8 sps:$4 sm:$0xff]  }
 0x13d   :  { %v3886_v60 = vld [vmem:[%s4237_s5 + $0x70] sm:$0xff]  }
 0x13f   :  { %2392 = vmatpush1.bf16.msra.mxu0 %v3793_v28  ;;  %3284 = vmatpush3.bf16.msra.mxu1 %v3885_v61  ;;  %v3832_v28 = vld [vmem:[#allocation5 + $0x120] ss:$8 sps:$4 sm:$0xff]   ;;  %v3887_v61 = vld [vmem:[%s4237_s5 + $0x30] sm:$0xff]  }
 0x140   :  { %2393 = vmatprep.subr.bf16.mxu0 %v3798_v29  ;;  %v3837_v29 = vld [vmem:[#allocation5 + $0x134] ss:$8 sps:$4 sm:$0xff]   ;;  %3285 = vmatprep.subr.bf16.mxu1 %v3886_v60 }
 0x143   :  { %2394 = vmatpush1.bf16.msra.mxu0 %v3796_v30  ;;  %v3835_v30 = vld [vmem:[#allocation5 + $0x130] ss:$8 sps:$4 sm:$0xff]   ;;  %3286 = vmatpush3.bf16.msra.mxu1 %v3887_v61 }
 0x144   :  { %2395 = vmatprep.subr.bf16.mxu0 %v3801_v31  ;;  %v3840_v31 = vld [vmem:[#allocation5 + $0x144] ss:$8 sps:$4 sm:$0xff]   ;;  %3287 = vmatprep.subr.bf16.mxu1 %v3888_v62 }
 0x147   :  { %2396 = vmatpush1.bf16.msra.mxu0 %v3799_v32  ;;  %v3838_v32 = vld [vmem:[#allocation5 + $0x140] ss:$8 sps:$4 sm:$0xff]  }
 0x148   :  { %2397 = vmatprep.subr.bf16.mxu0 %v3804_v33  ;;  %v3843_v33 = vld [vmem:[#allocation5 + $0x154] ss:$8 sps:$4 sm:$0xff]  }
 0x14b   :  { %2398 = vmatpush1.bf16.msra.mxu0 %v3802_v34  ;;  %v3841_v34 = vld [vmem:[#allocation5 + $0x150] ss:$8 sps:$4 sm:$0xff]  }
 0x14c   :  { %2399 = vmatprep.subr.bf16.mxu0 %v3807_v35  ;;  %v3846_v35 = vld [vmem:[#allocation5 + $0x164] ss:$8 sps:$4 sm:$0xff]  }
 0x14f   :  { %2400 = vmatpush1.bf16.msra.mxu0 %v3805_v36  ;;  %v3844_v36 = vld [vmem:[#allocation5 + $0x160] ss:$8 sps:$4 sm:$0xff]  }
 0x150   :  { %2401 = vmatprep.subr.bf16.mxu0 %v3810_v37  ;;  %v3849_v37 = vld [vmem:[#allocation5 + $0x174] ss:$8 sps:$4 sm:$0xff]  }
 0x153   :  { %2402 = vmatpush1.bf16.msra.mxu0 %v3808_v38  ;;  %v3847_v38 = vld [vmem:[#allocation5 + $0x170] ss:$8 sps:$4 sm:$0xff]  }
 0x154   :  { %2403 = vmatprep.subr.bf16.mxu0 %v3813_v39  ;;  %v3852_v39 = vld [vmem:[#allocation5 + $0x184] ss:$8 sps:$4 sm:$0xff]  }
 0x157   :  { %2404 = vmatpush1.bf16.msra.mxu0 %v3811_v40  ;;  %v3850_v40 = vld [vmem:[#allocation5 + $0x180] ss:$8 sps:$4 sm:$0xff]  }
 0x158   :  { %2405 = vmatprep.subr.bf16.mxu0 %v3816_v41  ;;  %v3855_v41 = vld [vmem:[#allocation5 + $0x194] ss:$8 sps:$4 sm:$0xff]  }
 0x15b   :  { %2406 = vmatpush1.bf16.msra.mxu0 %v3814_v42  ;;  %v3853_v42 = vld [vmem:[#allocation5 + $0x190] ss:$8 sps:$4 sm:$0xff]  }
 0x15c   :  { %2407 = vmatprep.subr.bf16.mxu0 %v3819_v43  ;;  %v3858_v43 = vld [vmem:[#allocation5 + $0x1a4] ss:$8 sps:$4 sm:$0xff]  }
 0x15f   :  { %2408 = vmatpush1.bf16.msra.mxu0 %v3817_v44  ;;  %v3856_v44 = vld [vmem:[#allocation5 + $0x1a0] ss:$8 sps:$4 sm:$0xff]  }
 0x160   :  { %2409 = vmatprep.subr.bf16.mxu0 %v3822_v45  ;;  %v3861_v45 = vld [vmem:[#allocation5 + $0x1b4] ss:$8 sps:$4 sm:$0xff]  }
 0x163   :  { %2410 = vmatpush1.bf16.msra.mxu0 %v3820_v46  ;;  %v3859_v46 = vld [vmem:[#allocation5 + $0x1b0] ss:$8 sps:$4 sm:$0xff]  }
 0x164   :  { %2411 = vmatprep.subr.bf16.mxu0 %v3825_v47  ;;  %v3864_v47 = vld [vmem:[#allocation5 + $0x1c4] ss:$8 sps:$4 sm:$0xff]  }
 0x167   :  { %2412 = vmatpush1.bf16.msra.mxu0 %v3823_v48  ;;  %v3862_v48 = vld [vmem:[#allocation5 + $0x1c0] ss:$8 sps:$4 sm:$0xff]  }
 0x168   :  { %2422 = vmatprep.subr.bf16.mxu0 %v3828_v49  ;;  %v359_v49 = vsub.s32 2, %v4117_v63  ;;  %v3891_v63 = vld [vmem:[%s4239_s7 + $0x8] sm:$0xff]  }
 0x16a   :  { %v360_v52 = vrot.slane %v4123_v1, %v359_v49  ;;  %v3889_v1 = vld [vmem:[%s4237_s5 + $0x38] sm:$0xff]  }
 0x16b   :  { %3288 = vmatpush3.bf16.msra.mxu1 %v3889_v1 }
 0x16c   :  { %3312 = vmatprep.subr.bf16.mxu1 %v3958_v3 }
 0x1fd   :  { %v1806_v7 = vpop.f32.mrb[0].mxu0  ;;  %v4134_v8 = vpop.f32.mrb[0].mxu1 }
 0x1fe   :  { %v3352_v9 = vadd.f32 %v1806_v7, %v352_v4  ;;  %v1808_v10 = vpop.f32.mrb[1].mxu0  ;;  %v1972_v11 = vpop.f32.mrb[1].mxu1  ;;  %v3354_v55 = vadd.f32 %v4134_v8, %v360_v52  ;;  %v2049_v4 = vld [vmem:[%s4236_s4] sm:$0x3] }
 0x1ff   :  { %v3353_v12 = vadd.f32 %v1808_v10, %v356_v5  ;;  %v3355_v13 = vadd.f32 %v1972_v11, %v364_v6  ;;  %v1810_v14 = vpop.f32.mrb[2].mxu0  ;;  %v1974_v15 = vpop.f32.mrb[2].mxu1  ;;  %v2054_v5 = vrot.slane %v2049_v4, %v351_v0  ;;  %v2058_v6 = vrot.slane %v2049_v4, %v355_v2  ;;  %v3892_v0 = vld [vmem:[%s4239_s7 + $0x10] sm:$0xff]   ;;  %v3893_v2 = vld [vmem:[%s4239_s7 + $0x18] sm:$0xff]  }
 0x200   :  { %v1977_v16 = vmax.f32 %v3352_v9, 0.0  ;;  %v1811_v17 = vpop.f32.mrb[3].mxu0  ;;  %v1975_v18 = vpop.f32.mrb[3].mxu1  ;;  %v1979_v58 = vmax.f32 %v3354_v55, 0.0 }
 0x201   :  { %v1978_v19 = vmax.f32 %v3353_v12, 0.0  ;;  %v1980_v20 = vmax.f32 %v3355_v13, 0.0  ;;  %v3894_v18 = vld [vmem:[%s4239_s7 + $0x20] sm:$0xff]  }
 0x202   :  { %v1981_v23 = vpack.c.bf16 %v1977_v16, %v1977_v16  ;;  %v1983_v59 = vpack.c.bf16 %v1979_v58, %v1979_v58  ;;  %v3890_v16 = vld [vmem:[%s4239_s7] sm:$0xff]  }
 0x203   :  { %v1982_v21 = vpack.c.bf16 %v1978_v19, %v1978_v19  ;;  %v1984_v25 = vpack.c.bf16 %v1980_v20, %v1980_v20  ;;  %v3895_v19 = vld [vmem:[%s4239_s7 + $0x28] sm:$0xff]   ;;  %v3896_v20 = vld [vmem:[%s4239_s7 + $0x30] sm:$0xff]  }
 0x205   :  { %2413 = vmatprep.mubr.bf16.mxu0 %v1982_v21  ;;  %v3897_v21 = vld [vmem:[%s4239_s7 + $0x38] sm:$0xff]  }
 0x206   :  { %2414 = vmatmul.mubr.bf16.vlgmr.msra.gmra.mrb[4].mxu0 %v1981_v23  ;;  %v3237_v23 = vld [vmem:[%s4238_s6] ss:$0 sm:$0xff] }
 0x207   :  { %2423 = vmatpush1.bf16.msra.mxu0 %v3826_v22  ;;  %2454 = vmatprep.mubr.bf16.mxu0 %v1984_v25 }
 0x208   :  { %2424 = vmatprep.subr.bf16.mxu0 %v3831_v24 }
 0x20b   :  { %2425 = vmatpush1.bf16.msra.mxu0 %v3829_v26 }
 0x20c   :  { %2426 = vmatprep.subr.bf16.mxu0 %v3834_v27 }
 0x20f   :  { %2427 = vmatpush1.bf16.msra.mxu0 %v3832_v28 }
 0x210   :  { %2428 = vmatprep.subr.bf16.mxu0 %v3837_v29 }
 0x213   :  { %2429 = vmatpush1.bf16.msra.mxu0 %v3835_v30  ;;  %v3898_v30 = vld [vmem:[%s4241_s9] sm:$0xff]  }
 0x214   :  { %2430 = vmatprep.subr.bf16.mxu0 %v3840_v31 }
 0x217   :  { %2431 = vmatpush1.bf16.msra.mxu0 %v3838_v32  ;;  %v3899_v32 = vld [vmem:[%s4241_s9 + $0x8] sm:$0xff]  }
 0x218   :  { %2432 = vmatprep.subr.bf16.mxu0 %v3843_v33  ;;  %v3900_v33 = vld [vmem:[%s4241_s9 + $0x10] sm:$0xff]  }
 0x21b   :  { %2433 = vmatpush1.bf16.msra.mxu0 %v3841_v34  ;;  %v3901_v34 = vld [vmem:[%s4241_s9 + $0x18] sm:$0xff]  }
 0x21c   :  { %2434 = vmatprep.subr.bf16.mxu0 %v3846_v35  ;;  %v3254_v35 = vld [vmem:[%s4240_s8] ss:$0 sm:$0xff] }
 0x21f   :  { %2435 = vmatpush1.bf16.msra.mxu0 %v3844_v36 }
 0x220   :  { %2436 = vmatprep.subr.bf16.mxu0 %v3849_v37 }
 0x223   :  { %2437 = vmatpush1.bf16.msra.mxu0 %v3847_v38 }
 0x224   :  { %2438 = vmatprep.subr.bf16.mxu0 %v3852_v39 }
 0x227   :  { %2439 = vmatpush1.bf16.msra.mxu0 %v3850_v40 }
 0x228   :  { %2440 = vmatprep.subr.bf16.mxu0 %v3855_v41 }
 0x22b   :  { %2441 = vmatpush1.bf16.msra.mxu0 %v3853_v42  ;;  %v3902_v42 = vld [vmem:[%s4243_s11] sm:$0xff]  }
 0x22c   :  { %2442 = vmatprep.subr.bf16.mxu0 %v3858_v43 }
 0x22f   :  { %2443 = vmatpush1.bf16.msra.mxu0 %v3856_v44  ;;  %v3903_v44 = vld [vmem:[%s4243_s11 + $0x8] sm:$0xff]  }
 0x230   :  { %2444 = vmatprep.subr.bf16.mxu0 %v3861_v45  ;;  %v3263_v45 = vld [vmem:[%s4242_s10] ss:$0 sm:$0xff] }
 0x233   :  { %2445 = vmatpush1.bf16.msra.mxu0 %v3859_v46 }
 0x234   :  { %2446 = vmatprep.subr.bf16.mxu0 %v3864_v47 }
 0x237   :  { %2447 = vmatpush1.bf16.msra.mxu0 %v3862_v48 }
 0x238   :  { %2448 = vmatprep.subr.bf16.mxu0 %v3867_v50 }
 0x23b   :  { %2449 = vmatpush1.bf16.msra.mxu0 %v3865_v51 }
 0x23c   :  { %2450 = vmatprep.subr.bf16.mxu0 %v3870_v53  ;;  %v3269_v53 = vld [vmem:[#allocation2] ss:$0 sm:$0xff] }
 0x23f   :  { %2451 = vmatpush1.bf16.msra.mxu0 %v3868_v54 }
 0x240   :  { %2452 = vmatprep.subr.bf16.mxu0 %v3873_v56 }
 0x243   :  { %2453 = vmatpush1.bf16.msra.mxu0 %v3871_v57 }
 0x246   :  { %2455 = vmatmul.mubr.bf16.vlgmr.msra.gmra.mrb[4].mxu0 %v1983_v59 }
 0x319   :  { %v2456_v7 = vpop.f32.mrb[4].mxu0 }
 0x31a   :  { %v3356_v8 = vadd.f32 %v2456_v7, %v2054_v5  ;;  %v2458_v9 = vpop.f32.mrb[5].mxu0 }
 0x31b   :  { %v3357_v10 = vadd.f32 %v2458_v9, %v2058_v6  ;;  %v2460_v11 = vpop.f32.mrb[6].mxu0 }
 0x31c   :  { %v2463_v12 = vmax.f32 %v3356_v8, 0.0  ;;  %v2461_v13 = vpop.f32.mrb[7].mxu0 }
 0x31d   :  { %v2464_v14 = vmax.f32 %v3357_v10, 0.0 }
 0x31e   :  { %v2465_v17 = vpack.c.bf16 %v2463_v12, %v2463_v12 }
 0x31f   :  { %v2466_v15 = vpack.c.bf16 %v2464_v14, %v2464_v14 }
 0x321   :  { %2634 = vmatprep.mubr.bf16.mxu1 %v2466_v15 }
 0x322   :  { %2635 = vmatmul.mubr.bf16.vlgmr.msra.gmra.mrb[4].mxu1 %v2465_v17 }
 0x323   :  { %3313 = vmatpush3.bf16.msra.mxu1 %v3890_v16  ;;  %3328 = vmatprep.mubr.msk.bf16.mxu1 %vm3959_vm0, %v3958_v3 }
 0x324   :  { %3314 = vmatprep.subr.bf16.mxu1 %v3958_v3 }
 0x327   :  { %3315 = vmatpush3.bf16.msra.mxu1 %v3891_v63 }
 0x328   :  { %3316 = vmatprep.subr.bf16.mxu1 %v3958_v3 }
 0x32b   :  { %3317 = vmatpush3.bf16.msra.mxu1 %v3892_v0 }
 0x32c   :  { %3318 = vmatprep.subr.bf16.mxu1 %v3958_v3 }
 0x32f   :  { %3319 = vmatpush3.bf16.msra.mxu1 %v3893_v2 }
 0x330   :  { %3320 = vmatprep.subr.bf16.mxu1 %v3958_v3 }
 0x333   :  { %3321 = vmatpush3.bf16.msra.mxu1 %v3894_v18 }
 0x334   :  { %3322 = vmatprep.subr.bf16.mxu1 %v3958_v3 }
 0x337   :  { %3323 = vmatpush3.bf16.msra.mxu1 %v3895_v19 }
 0x338   :  { %3324 = vmatprep.subr.bf16.mxu1 %v3958_v3 }
 0x33b   :  { %3325 = vmatpush3.bf16.msra.mxu1 %v3896_v20 }
 0x33c   :  { %3326 = vmatprep.subr.bf16.mxu1 %v3958_v3 }
 0x33f   :  { %3327 = vmatpush3.bf16.msra.mxu1 %v3897_v21 }
 0x340   :  { %3332 = vmatprep.subr.bf16.mxu1 %v3958_v3 }
 0x3f5   :  { %v3289_v22 = vpop.f32.mrb[4].mxu1 }
 0x3f6   :  { %v3290_v24 = vpop.f32.mrb[5].mxu1 }
 0x3f7   :  { %v3291_v25 = vadd.f32 %v3290_v24, %v3289_v22  ;;  %v3292_v26 = vpop.f32.mrb[6].mxu1 }
 0x3f8   :  { %v3293_v27 = vpop.f32.mrb[7].mxu1 }
 0x3f9   :  { %v2637_v28 = vadd.f32 %v3291_v25, %v3237_v23 }
 0x3fb   :  { %v2642_v29 = vmax.f32 %v2637_v28, 0.0 }
 0x3fd   :  { %v2643_v31 = vpack.c.bf16 %v2642_v29, %v2642_v29 }
 0x3ff   :  { %3329 = vmatmul.mubr.bf16.vlgmr.msra.gmra.mrb[8].mxu1 %v2643_v31 }
 0x400   :  { %3333 = vmatpush3.bf16.msra.mxu1 %v3898_v30  ;;  %3340 = vmatprep.mubr.msk.bf16.mxu1 %vm3959_vm0, %v3958_v3 }
 0x401   :  { %3334 = vmatprep.subr.bf16.mxu1 %v3958_v3 }
 0x404   :  { %3335 = vmatpush3.bf16.msra.mxu1 %v3899_v32 }
 0x405   :  { %3336 = vmatprep.subr.bf16.mxu1 %v3958_v3 }
 0x408   :  { %3337 = vmatpush3.bf16.msra.mxu1 %v3900_v33 }
 0x409   :  { %3338 = vmatprep.subr.bf16.mxu1 %v3958_v3 }
 0x40c   :  { %3339 = vmatpush3.bf16.msra.mxu1 %v3901_v34 }
 0x40d   :  { %3344 = vmatprep.subr.bf16.mxu1 %v3958_v3 }
 0x4d2   :  { %v2749_v36 = vpop.f32.mrb[8].mxu1 }
 0x4d3   :  { %v2750_v37 = vadd.f32 %v3254_v35, %v2749_v36  ;;  %v3330_v38 = vpop.f32.mrb[9].mxu1 }
 0x4d4   :  { %v2752_v39 = vpop.f32.mrb[10].mxu1 }
 0x4d5   :  { %v2755_v40 = vmax.f32 %v2750_v37, 0.0  ;;  %v3331_v41 = vpop.f32.mrb[11].mxu1 }
 0x4d7   :  { %v2756_v43 = vpack.c.bf16 %v2755_v40, %v2755_v40 }
 0x4d9   :  { %3341 = vmatmul.mubr.msk.bf16.vlgmr.msra.gmra.mrb[12].mxu1 %vm2796_vm1, %v2756_v43 }
 0x4da   :  { %3345 = vmatpush3.bf16.msra.mxu1 %v3902_v42  ;;  %3348 = vmatprep.mubr.msk.bf16.mxu1 %vm3959_vm0, %v3958_v3 }
 0x4db   :  { %3346 = vmatprep.subr.bf16.mxu1 %v3958_v3 }
 0x4de   :  { %3347 = vmatpush3.bf16.msra.mxu1 %v3903_v44 }
 0x5ac   :  { %v2834_v46 = vpop.f32.mrb[12].mxu1 }
 0x5ad   :  { %v2835_v47 = vadd.f32 %v3263_v45, %v2834_v46  ;;  %v3342_v48 = vpop.f32.mrb[13].mxu1 }
 0x5ae   :  { %v2837_v49 = vpop.f32.mrb[14].mxu1 }
 0x5af   :  { %v2840_v50 = vmax.f32 %v2835_v47, 0.0  ;;  %v3343_v51 = vpop.f32.mrb[15].mxu1 }
 0x5b1   :  { %v2841_v52 = vpack.c.bf16 %v2840_v50, %v2840_v50 }
 0x5b3   :  { %3349 = vmatmul.mubr.msk.bf16.vlgmr.msra.gmra.mrb[16].mxu1 %vm2865_vm2, %v2841_v52 }
 0x686   :  { %v2903_v54 = vpop.f32.mrb[16].mxu1 }
 0x687   :  { %v2904_v55 = vadd.f32 %v3269_v53, %v2903_v54  ;;  %v3350_v56 = vpop.f32.mrb[17].mxu1 }
 0x688   :  { %v2906_v57 = vpop.f32.mrb[18].mxu1 }
 0x689   :  { %2910 = vst.msk [vmem:[%s4245_s13] sm:$0xff] %vm2909_vm3, %v2904_v55  ;;  %v3351_v58 = vpop.f32.mrb[19].mxu1 }
 0x68a   :  { %2915 = vsyncpa [#allocation4], 1 }
 0x68b   :  { %2916 = vsyncpa [#allocation6], 1 }

</bundles_post_ra>
